<compile_context>
chip_gen: v6e
topology: v6e:2x2x1
jax: 0.10.0
libtpu: 0.0.40
codegen_flags: <defaults>
</compile_context>

<pallas_src>
import functools

import jax
import jax.numpy as jnp
from jax.experimental import pallas as pl
from jax.experimental.pallas import tpu as pltpu


def _layernorm_f32(x, w, b, eps=1e-5):
    """LayerNorm computed in fp32 (matches the torch fp16-safe LayerNorm subclass)."""
    x32 = x.astype(jnp.float32)
    mu = jnp.mean(x32, axis=-1, keepdims=True)
    var = jnp.mean(jnp.square(x32 - mu), axis=-1, keepdims=True)
    return (x32 - mu) * jax.lax.rsqrt(var + eps) * w + b


def residual_attention_block_kernel(
    x_ref,
    ln1w_ref, ln1b_ref,
    wqkv_ref, bqkv_ref,
    wo_ref, bo_ref,
    ln2w_ref, ln2b_ref,
    wfc_ref, bfc_ref,
    wpj_ref, bpj_ref,
    o_ref,
    ctx_ref,                       # VMEM scratch (nb*Lp, E), compute dtype
    *, n_head, seq_len, compute_dtype,
):
    nb, Lp, E = x_ref.shape
    dh = E // n_head
    scale = 1.0 / (dh ** 0.5)
    cd = compute_dtype
    exact_f32 = jnp.dtype(cd) == jnp.dtype(jnp.float32)

    # Lp is padded to a multiple of 8 by the wrapper, so these 3D<->2D folds do
    # not cross sublane-tile boundaries (no relayout copies).
    x2d = x_ref[...].reshape(nb * Lp, E).astype(jnp.float32)

    # ---------------- x + attn(ln_1(x)) ----------------
    h1 = _layernorm_f32(x2d, ln1w_ref[...], ln1b_ref[...])
    qkv = jnp.dot(h1.astype(cd), wqkv_ref[...],
                  preferred_element_type=jnp.float32) + bqkv_ref[...]    # (M, 3E)

    q = (qkv[:, :E] * scale).reshape(nb, Lp, E).astype(cd)   # fold 1/sqrt(dh) into q
    k = qkv[:, E:2 * E].reshape(nb, Lp, E).astype(cd)
    v = qkv[:, 2 * E:].reshape(nb, Lp, E).astype(cd)

    # Additive key mask for rows the wrapper padded L with (static branch).
    key_bias = None
    if seq_len != Lp:
        key_bias = jnp.where(
            jax.lax.broadcasted_iota(jnp.int32, (1, Lp), 1) < seq_len,
            0.0, -1e30).astype(jnp.float32)                  # (1, Lp)

    # Per-head attention (static unroll; n_head is small).  Each head's context
    # is stored straight into the VMEM scratch column slice -> no concatenate
    # relayout chain, and the einsums stay in the single-leading-batch-dim form
    # Mosaic lowers natively.
    # TODO(synk): fully head-stacked (nb,H,L,dh) einsums need a 2-batch-dim
    # dot_general, which Mosaic does not reliably lower.
    for h in range(n_head):
        sl = slice(h * dh, (h + 1) * dh)
        s = jnp.einsum("bqd,bkd->bqk", q[:, :, sl], k[:, :, sl],
                       preferred_element_type=jnp.float32)              # (nb, Lp, Lp)
        if key_bias is not None:
            s = s + key_bias
        s = s - jnp.max(s, axis=-1, keepdims=True)
        p = jnp.exp(s)
        denom = jnp.sum(p, axis=-1, keepdims=True)
        if exact_f32:
            p = p / denom                                    # exact f32 path
        else:
            p = p * pl.reciprocal(denom, approx=True)        # EUP, frees VALU
        ctx_h = jnp.einsum("bqk,bkd->bqd", p.astype(cd), v[:, :, sl],
                           preferred_element_type=jnp.float32)
        ctx_ref[:, sl] = ctx_h.reshape(nb * Lp, dh).astype(ctx_ref.dtype)

    attn_out = jnp.dot(ctx_ref[...], wo_ref[...],
                       preferred_element_type=jnp.float32) + bo_ref[...]
    x1 = x2d + attn_out                                                  # f32 residual

    # ---------------- x + mlp(ln_2(x)) ----------------
    h2 = _layernorm_f32(x1, ln2w_ref[...], ln2b_ref[...])
    f = jnp.dot(h2.astype(cd), wfc_ref[...],
                preferred_element_type=jnp.float32) + bfc_ref[...]       # (M, 4E)
    if jnp.dtype(cd) == jnp.dtype(jnp.bfloat16):
        # bf16 VPU/EUP on v6e/v7x: halves elementwise work on the largest
        # activation; the next matmul wants bf16 anyway.
        # (v5e has no bf16 VPU/EUP -- pass compute_dtype=float32 there if needed.)
        fb = f.astype(cd)
        g = fb * jax.nn.sigmoid(1.702 * fb)                              # QuickGELU
    else:
        g = (f * jax.nn.sigmoid(1.702 * f)).astype(cd)
    m = jnp.dot(g, wpj_ref[...],
                preferred_element_type=jnp.float32) + bpj_ref[...]

    o_ref[...] = (x1 + m).reshape(nb, Lp, E).astype(o_ref.dtype)


def _vmem_limit_bytes():
    """Per-generation scoped VMEM limit (leave headroom for Mosaic scratch)."""
    try:
        cap = pltpu.get_tpu_info().vmem_capacity_bytes
    except Exception:
        cap = 64 * 1024 * 1024     # conservative fallback (v7x-sized)
    return int(max(32 * 1024 * 1024,
                   min(cap - 16 * 1024 * 1024, 100 * 1024 * 1024)))


def prepare_params(params, compute_dtype=jnp.bfloat16):
    """One-time weight re-layout: fuse QKV, (out,in)->(in,out), cast MXU weights.

    Call once at load time and pass the result to the block functions so this
    (pure re-layout of constant weights) stays off the per-call hot path.
    """
    cd = compute_dtype
    r2 = lambda a: jnp.asarray(a, jnp.float32).reshape(1, -1)
    wqkv = jnp.concatenate([jnp.asarray(params["wq"]), jnp.asarray(params["wk"]),
                            jnp.asarray(params["wv"])], axis=0).T.astype(cd)  # (E, 3E)
    bqkv = jnp.concatenate([r2(params["bq"]), r2(params["bk"]), r2(params["bv"])],
                           axis=-1)                                            # (1, 3E)
    return (
        r2(params["ln1_w"]), r2(params["ln1_b"]),
        wqkv, bqkv,
        jnp.asarray(params["wo"]).T.astype(cd), r2(params["bo"]),
        r2(params["ln2_w"]), r2(params["ln2_b"]),
        jnp.asarray(params["wfc"]).T.astype(cd), r2(params["bfc"]),
        jnp.asarray(params["wpj"]).T.astype(cd), r2(params["bpj"]),
    )


def residual_attention_block_nle(x_nle, params, n_head, *,
                                 compute_dtype=jnp.bfloat16, batch_block=None):
    """Batch-major entry point: x_nle has shape (N, L, E). No HBM transposes."""
    N, L, E = x_nle.shape
    assert E % n_head == 0
    cd = compute_dtype

    if isinstance(params, dict):
        weights = prepare_params(params, cd)   # convenience path; prefer pre-preparing
    else:
        weights = tuple(params)                # already prepared with this compute dtype

    # Pad L to a multiple of 8 so in-kernel folds are free; padded keys are
    # masked to -inf inside the kernel, padded query rows are sliced off here.
    Lp = ((L + 7) // 8) * 8
    x = x_nle
    if Lp != L:
        x = jnp.pad(x, ((0, 0), (0, Lp - L), (0, 0)))

    # batch_block: target M = nb*Lp in ~[512, 1024] rows to fill the MXU and
    # amortize per-grid-step pipeline overhead; keep >= 2 grid steps when
    # possible so megacore (v7x) can shard the batch axis over both cores.
    if batch_block is None:
        nb = max(1, min(N, pl.cdiv(512, Lp)))
        if N > 1 and pl.cdiv(N, nb) < 2:
            nb = pl.cdiv(N, 2)
    else:
        nb = max(1, min(N, batch_block))
    n_blocks = pl.cdiv(N, nb)
    n_pad = n_blocks * nb
    if n_pad != N:
        x = jnp.pad(x, ((0, n_pad - N), (0, 0), (0, 0)))

    kernel = functools.partial(residual_attention_block_kernel,
                               n_head=n_head, seq_len=L, compute_dtype=cd)

    def call(single_buffer_weights):
        w_specs = []
        for w in weights:
            nd = w.ndim
            idx = lambda n, _nd=nd: (0,) * _nd
            if single_buffer_weights:
                # Grid-invariant weights: single-buffer them (double-buffering
                # only doubles VMEM residency; matters most on v7x / 64 MiB).
                w_specs.append(pl.BlockSpec(w.shape, idx,
                                            pipeline_mode=pl.Buffered(1)))
            else:
                w_specs.append(pl.BlockSpec(w.shape, idx))
        return pl.pallas_call(
            kernel,
            out_shape=jax.ShapeDtypeStruct((n_pad, Lp, E), x.dtype),
            grid=(n_blocks,),
            in_specs=[pl.BlockSpec((nb, Lp, E), lambda n: (n, 0, 0))] + w_specs,
            out_specs=pl.BlockSpec((nb, Lp, E), lambda n: (n, 0, 0)),
            scratch_shapes=[pltpu.VMEM((nb * Lp, E), cd)],
            compiler_params=pltpu.CompilerParams(
                dimension_semantics=("parallel",),       # v7x: batch over both TCs
                vmem_limit_bytes=_vmem_limit_bytes(),    # per-generation limit
            ),
        )(x, *weights)

    try:
        out = call(True)
    except Exception:
        # TODO(synk): drop this fallback once pl.Buffered(1) is guaranteed by
        # the deployed JAX; it only costs extra (double-buffered) weight VMEM.
        out = call(False)

    return out[:N, :L]


def residual_attention_block(x_lne, params, n_head, **kwargs):
    """(L, N, E) module-compatible interface.

    Batch-major callers should use `residual_attention_block_nle` directly to
    avoid these two full-tensor HBM transposes.
    """
    out = residual_attention_block_nle(jnp.transpose(x_lne, (1, 0, 2)),
                                       params, n_head, **kwargs)
    return jnp.transpose(out, (1, 0, 2))


# ------------------------- pure-JAX reference (fp32) ------------------------
def reference_block(x_lne, p, n_head):
    L, N, E = x_lne.shape
    dh = E // n_head
    scale = 1.0 / (dh ** 0.5)

    def ln(x, w, b):
        mu = jnp.mean(x, axis=-1, keepdims=True)
        var = jnp.mean(jnp.square(x - mu), axis=-1, keepdims=True)
        return (x - mu) * jax.lax.rsqrt(var + 1e-5) * w + b

    x = jnp.transpose(x_lne, (1, 0, 2))  # (N, L, E)
    h1 = ln(x, p["ln1_w"], p["ln1_b"])
    q = h1 @ p["wq"].T + p["bq"]
    k = h1 @ p["wk"].T + p["bk"]
    v = h1 @ p["wv"].T + p["bv"]
    q = q.reshape(N, L, n_head, dh).transpose(0, 2, 1, 3)
    k = k.reshape(N, L, n_head, dh).transpose(0, 2, 1, 3)
    v = v.reshape(N, L, n_head, dh).transpose(0, 2, 1, 3)
    s = jnp.einsum("nhqd,nhkd->nhqk", q, k) * scale
    a = jax.nn.softmax(s, axis=-1)
    ctx = jnp.einsum("nhqk,nhkd->nhqd", a, v).transpose(0, 2, 1, 3).reshape(N, L, E)
    x1 = x + (ctx @ p["wo"].T + p["bo"])
    h2 = ln(x1, p["ln2_w"], p["ln2_b"])
    f = h2 @ p["wfc"].T + p["bfc"]
    g = f * jax.nn.sigmoid(1.702 * f)
    out = x1 + (g @ p["wpj"].T + p["bpj"])
    return jnp.transpose(out, (1, 0, 2))


if __name__ == "__main__":
    E, H = 32, 4
    key = jax.random.PRNGKey(0)
    keys = jax.random.split(key, 16)

    def rnd(k, shape, s=0.02):
        return (s * jax.random.normal(k, shape)).astype(jnp.float32)

    # nn.MultiheadAttention: in_proj_weight (3E, E), in_proj_bias (3E,),
    # out_proj (E, E)+(E,).  nn.Linear: weight (out, in), bias (out,).
    params = {
        "ln1_w": jnp.ones((1, E), jnp.float32),
        "ln1_b": jnp.zeros((1, E), jnp.float32),
        "wq": rnd(keys[0], (E, E)), "wk": rnd(keys[1], (E, E)), "wv": rnd(keys[2], (E, E)),
        "bq": rnd(keys[3], (1, E)), "bk": rnd(keys[4], (1, E)), "bv": rnd(keys[5], (1, E)),
        "wo": rnd(keys[6], (E, E)), "bo": rnd(keys[7], (1, E)),
        "ln2_w": jnp.ones((1, E), jnp.float32),
        "ln2_b": jnp.zeros((1, E), jnp.float32),
        "wfc": rnd(keys[8], (4 * E, E)), "bfc": rnd(keys[9], (1, 4 * E)),
        "wpj": rnd(keys[10], (E, 4 * E)), "bpj": rnd(keys[11], (1, E)),
    }

    # One-time weight re-layout (hoisted off the per-call hot path).
    prep_f32 = prepare_params(params, jnp.float32)
    prep_bf16 = prepare_params(params, jnp.bfloat16)

    # ---- test 1: L multiple of 8; exact f32 path and default bf16 path ----
    L, N = 8, 2
    x = jax.random.normal(keys[12], (L, N, E), jnp.float32)
    ref = reference_block(x, params, n_head=H)

    out_f32 = jax.block_until_ready(
        residual_attention_block(x, prep_f32, H, compute_dtype=jnp.float32))
    assert out_f32.shape == (L, N, E)
    assert jnp.allclose(out_f32, ref, atol=1e-3, rtol=1e-3), "f32 mismatch vs reference"

    out_bf16 = jax.block_until_ready(
        residual_attention_block(x, prep_bf16, H))          # compute_dtype=bf16
    assert out_bf16.shape == (L, N, E)
    assert jnp.allclose(out_bf16, ref, atol=2e-2, rtol=2e-2), "bf16 mismatch vs reference"

    # ---- test 2: L not a multiple of 8 (seq padding + key masking) and a
    #              batch size that needs batch padding (dict-params path) ----
    L2, N2 = 7, 5
    x2 = jax.random.normal(keys[13], (L2, N2, E), jnp.float32)
    ref2 = reference_block(x2, params, n_head=H)
    out2 = jax.block_until_ready(
        residual_attention_block(x2, params, H,
                                 compute_dtype=jnp.float32, batch_block=2))
    assert out2.shape == (L2, N2, E)
    assert jnp.allclose(out2, ref2, atol=1e-3, rtol=1e-3), "padded/masked mismatch"

    print("KERNEL_OK")
</pallas_src>

<mosaic_0001>
module attributes {stable_mosaic.version = 11 : i64} {
  func.func @residual_attention_block_kernel(%arg0: i32, %arg1: memref<1x8x32xf32, #tpu.memory_space<vmem>>, %arg2: memref<1x32xf32, #tpu.memory_space<vmem>>, %arg3: memref<1x32xf32, #tpu.memory_space<vmem>>, %arg4: memref<32x96xf32, #tpu.memory_space<vmem>>, %arg5: memref<1x96xf32, #tpu.memory_space<vmem>>, %arg6: memref<32x32xf32, #tpu.memory_space<vmem>>, %arg7: memref<1x32xf32, #tpu.memory_space<vmem>>, %arg8: memref<1x32xf32, #tpu.memory_space<vmem>>, %arg9: memref<1x32xf32, #tpu.memory_space<vmem>>, %arg10: memref<32x128xf32, #tpu.memory_space<vmem>>, %arg11: memref<1x128xf32, #tpu.memory_space<vmem>>, %arg12: memref<128x32xf32, #tpu.memory_space<vmem>>, %arg13: memref<1x32xf32, #tpu.memory_space<vmem>>, %arg14: memref<1x8x32xf32, #tpu.memory_space<vmem>>, %arg15: memref<8x32xf32, #tpu.memory_space<vmem>>) attributes {dimension_semantics = [#tpu.dimension_semantics<parallel>], iteration_bounds = array<i64: 2>, scalar_prefetch = 0 : i64, scratch_operands = 1 : i64, tpu.core_type = #tpu.core_type<tc>, window_params = [{transform_indices = @transform_0, window_bounds = array<i64: 1, 8, 32>}, {pipeline_mode = #tpu.pipeline_mode<synchronous>, transform_indices = @transform_1, window_bounds = array<i64: 1, 32>}, {pipeline_mode = #tpu.pipeline_mode<synchronous>, transform_indices = @transform_2, window_bounds = array<i64: 1, 32>}, {pipeline_mode = #tpu.pipeline_mode<synchronous>, transform_indices = @transform_3, window_bounds = array<i64: 32, 96>}, {pipeline_mode = #tpu.pipeline_mode<synchronous>, transform_indices = @transform_4, window_bounds = array<i64: 1, 96>}, {pipeline_mode = #tpu.pipeline_mode<synchronous>, transform_indices = @transform_5, window_bounds = array<i64: 32, 32>}, {pipeline_mode = #tpu.pipeline_mode<synchronous>, transform_indices = @transform_6, window_bounds = array<i64: 1, 32>}, {pipeline_mode = #tpu.pipeline_mode<synchronous>, transform_indices = @transform_7, window_bounds = array<i64: 1, 32>}, {pipeline_mode = #tpu.pipeline_mode<synchronous>, transform_indices = @transform_8, window_bounds = array<i64: 1, 32>}, {pipeline_mode = #tpu.pipeline_mode<synchronous>, transform_indices = @transform_9, window_bounds = array<i64: 32, 128>}, {pipeline_mode = #tpu.pipeline_mode<synchronous>, transform_indices = @transform_10, window_bounds = array<i64: 1, 128>}, {pipeline_mode = #tpu.pipeline_mode<synchronous>, transform_indices = @transform_11, window_bounds = array<i64: 128, 32>}, {pipeline_mode = #tpu.pipeline_mode<synchronous>, transform_indices = @transform_12, window_bounds = array<i64: 1, 32>}, {transform_indices = @transform_13, window_bounds = array<i64: 1, 8, 32>}]} {
    %c0 = arith.constant 0 : index
    %c0_0 = arith.constant 0 : index
    %c0_1 = arith.constant 0 : index
    %0 = vector.load %arg1[%c0, %c0_0, %c0_1] : memref<1x8x32xf32, #tpu.memory_space<vmem>>, vector<1x8x32xf32>
    %1 = vector.shape_cast %0 : vector<1x8x32xf32> to vector<8x32xf32>
    %c0_2 = arith.constant 0 : index
    %c0_3 = arith.constant 0 : index
    %2 = vector.load %arg2[%c0_2, %c0_3] : memref<1x32xf32, #tpu.memory_space<vmem>>, vector<1x32xf32>
    %c0_4 = arith.constant 0 : index
    %c0_5 = arith.constant 0 : index
    %3 = vector.load %arg3[%c0_4, %c0_5] : memref<1x32xf32, #tpu.memory_space<vmem>>, vector<1x32xf32>
    %cst = arith.constant dense<0.000000e+00> : vector<8xf32>
    %4 = vector.multi_reduction <add>, %1, %cst [1] : vector<8x32xf32> to vector<8xf32>
    %5 = vector.shape_cast %4 : vector<8xf32> to vector<8x1xf32>
    %cst_6 = arith.constant 3.200000e+01 : f32
    %6 = vector.broadcast %cst_6 : f32 to vector<8x1xf32>
    %7 = arith.divf %5, %6 : vector<8x1xf32>
    %8 = vector.broadcast %7 : vector<8x1xf32> to vector<8x32xf32>
    %9 = arith.subf %1, %8 : vector<8x32xf32>
    %10 = arith.mulf %9, %9 : vector<8x32xf32>
    %cst_7 = arith.constant dense<0.000000e+00> : vector<8xf32>
    %11 = vector.multi_reduction <add>, %10, %cst_7 [1] : vector<8x32xf32> to vector<8xf32>
    %12 = vector.shape_cast %11 : vector<8xf32> to vector<8x1xf32>
    %cst_8 = arith.constant 3.200000e+01 : f32
    %13 = vector.broadcast %cst_8 : f32 to vector<8x1xf32>
    %14 = arith.divf %12, %13 : vector<8x1xf32>
    %15 = vector.broadcast %7 : vector<8x1xf32> to vector<8x32xf32>
    %16 = arith.subf %1, %15 : vector<8x32xf32>
    %cst_9 = arith.constant 9.99999974E-6 : f32
    %17 = vector.broadcast %cst_9 : f32 to vector<8x1xf32>
    %18 = arith.addf %14, %17 : vector<8x1xf32>
    %19 = math.rsqrt %18 : vector<8x1xf32>
    %20 = vector.broadcast %19 : vector<8x1xf32> to vector<8x32xf32>
    %21 = arith.mulf %16, %20 : vector<8x32xf32>
    %22 = vector.broadcast %2 : vector<1x32xf32> to vector<8x32xf32>
    %23 = arith.mulf %21, %22 : vector<8x32xf32>
    %24 = vector.broadcast %3 : vector<1x32xf32> to vector<8x32xf32>
    %25 = arith.addf %23, %24 : vector<8x32xf32>
    %c0_10 = arith.constant 0 : index
    %c0_11 = arith.constant 0 : index
    %26 = vector.load %arg4[%c0_10, %c0_11] : memref<32x96xf32, #tpu.memory_space<vmem>>, vector<32x96xf32>
    %cst_12 = arith.constant dense<0.000000e+00> : vector<8x96xf32>
    %27 = tpu.matmul %25, %26, %cst_12 {dimension_numbers = #tpu.dot_dimension_numbers<[1], [0], [0], [1], [0, 0, 1, 1], [], []>} : vector<8x32xf32>, vector<32x96xf32>, vector<8x96xf32> -> vector<8x96xf32>
    %c0_13 = arith.constant 0 : index
    %c0_14 = arith.constant 0 : index
    %28 = vector.load %arg5[%c0_13, %c0_14] : memref<1x96xf32, #tpu.memory_space<vmem>>, vector<1x96xf32>
    %29 = vector.broadcast %28 : vector<1x96xf32> to vector<8x96xf32>
    %30 = arith.addf %27, %29 : vector<8x96xf32>
    %31 = vector.extract_strided_slice %30 {offsets = [0, 0], sizes = [8, 32], strides = [1, 1]} : vector<8x96xf32> to vector<8x32xf32>
    %cst_15 = arith.constant 0.353553385 : f32
    %32 = vector.broadcast %cst_15 : f32 to vector<8x32xf32>
    %33 = arith.mulf %31, %32 : vector<8x32xf32>
    %34 = vector.shape_cast %33 : vector<8x32xf32> to vector<1x8x32xf32>
    %35 = vector.extract_strided_slice %30 {offsets = [0, 32], sizes = [8, 32], strides = [1, 1]} : vector<8x96xf32> to vector<8x32xf32>
    %36 = vector.shape_cast %35 : vector<8x32xf32> to vector<1x8x32xf32>
    %37 = vector.extract_strided_slice %30 {offsets = [0, 64], sizes = [8, 32], strides = [1, 1]} : vector<8x96xf32> to vector<8x32xf32>
    %38 = vector.shape_cast %37 : vector<8x32xf32> to vector<1x8x32xf32>
    %39 = vector.extract_strided_slice %34 {offsets = [0, 0, 0], sizes = [1, 8, 8], strides = [1, 1, 1]} : vector<1x8x32xf32> to vector<1x8x8xf32>
    %40 = vector.extract_strided_slice %36 {offsets = [0, 0, 0], sizes = [1, 8, 8], strides = [1, 1, 1]} : vector<1x8x32xf32> to vector<1x8x8xf32>
    "tpu.trace_start"() <{level = 10 : i32, message = "bqd,bkd->bqk"}> : () -> ()
    %cst_16 = arith.constant dense<0.000000e+00> : vector<1x8x8xf32>
    %41 = tpu.matmul %39, %40, %cst_16 {dimension_numbers = #tpu.dot_dimension_numbers<[2], [2], [1], [1], [0, 0, 0, 1, 1, 1], [0], [0]>} : vector<1x8x8xf32>, vector<1x8x8xf32>, vector<1x8x8xf32> -> vector<1x8x8xf32>
    "tpu.trace_stop"() : () -> ()
    %cst_17 = arith.constant dense<0xFF800000> : vector<1x8xf32>
    %42 = vector.multi_reduction <maximumf>, %41, %cst_17 [2] : vector<1x8x8xf32> to vector<1x8xf32>
    %43 = vector.shape_cast %42 : vector<1x8xf32> to vector<1x8x1xf32>
    %44 = vector.broadcast %43 : vector<1x8x1xf32> to vector<1x8x8xf32>
    %45 = arith.subf %41, %44 : vector<1x8x8xf32>
    %46 = math.exp %45 : vector<1x8x8xf32>
    %cst_18 = arith.constant dense<0.000000e+00> : vector<1x8xf32>
    %47 = vector.multi_reduction <add>, %46, %cst_18 [2] : vector<1x8x8xf32> to vector<1x8xf32>
    %48 = vector.shape_cast %47 : vector<1x8xf32> to vector<1x8x1xf32>
    %49 = vector.broadcast %48 : vector<1x8x1xf32> to vector<1x8x8xf32>
    %50 = arith.divf %46, %49 : vector<1x8x8xf32>
    %51 = vector.extract_strided_slice %38 {offsets = [0, 0, 0], sizes = [1, 8, 8], strides = [1, 1, 1]} : vector<1x8x32xf32> to vector<1x8x8xf32>
    "tpu.trace_start"() <{level = 10 : i32, message = "bqk,bkd->bqd"}> : () -> ()
    %cst_19 = arith.constant dense<0.000000e+00> : vector<1x8x8xf32>
    %52 = tpu.matmul %50, %51, %cst_19 {dimension_numbers = #tpu.dot_dimension_numbers<[2], [1], [1], [2], [0, 0, 0, 1, 1, 2], [0], [0]>} : vector<1x8x8xf32>, vector<1x8x8xf32>, vector<1x8x8xf32> -> vector<1x8x8xf32>
    "tpu.trace_stop"() : () -> ()
    %53 = vector.shape_cast %52 : vector<1x8x8xf32> to vector<8x8xf32>
    %c0_20 = arith.constant 0 : index
    %c0_21 = arith.constant 0 : index
    %54 = vector.load %arg15[%c0_20, %c0_21] : memref<8x32xf32, #tpu.memory_space<vmem>>, vector<8x8xf32>
    tpu.vector_store %arg15[%c0_20, %c0_21], %53 {strides = array<i32>} : memref<8x32xf32, #tpu.memory_space<vmem>>, vector<8x8xf32>,
    %55 = vector.extract_strided_slice %34 {offsets = [0, 0, 8], sizes = [1, 8, 8], strides = [1, 1, 1]} : vector<1x8x32xf32> to vector<1x8x8xf32>
    %56 = vector.extract_strided_slice %36 {offsets = [0, 0, 8], sizes = [1, 8, 8], strides = [1, 1, 1]} : vector<1x8x32xf32> to vector<1x8x8xf32>
    "tpu.trace_start"() <{level = 10 : i32, message = "bqd,bkd->bqk"}> : () -> ()
    %cst_22 = arith.constant dense<0.000000e+00> : vector<1x8x8xf32>
    %57 = tpu.matmul %55, %56, %cst_22 {dimension_numbers = #tpu.dot_dimension_numbers<[2], [2], [1], [1], [0, 0, 0, 1, 1, 1], [0], [0]>} : vector<1x8x8xf32>, vector<1x8x8xf32>, vector<1x8x8xf32> -> vector<1x8x8xf32>
    "tpu.trace_stop"() : () -> ()
    %cst_23 = arith.constant dense<0xFF800000> : vector<1x8xf32>
    %58 = vector.multi_reduction <maximumf>, %57, %cst_23 [2] : vector<1x8x8xf32> to vector<1x8xf32>
    %59 = vector.shape_cast %58 : vector<1x8xf32> to vector<1x8x1xf32>
    %60 = vector.broadcast %59 : vector<1x8x1xf32> to vector<1x8x8xf32>
    %61 = arith.subf %57, %60 : vector<1x8x8xf32>
    %62 = math.exp %61 : vector<1x8x8xf32>
    %cst_24 = arith.constant dense<0.000000e+00> : vector<1x8xf32>
    %63 = vector.multi_reduction <add>, %62, %cst_24 [2] : vector<1x8x8xf32> to vector<1x8xf32>
    %64 = vector.shape_cast %63 : vector<1x8xf32> to vector<1x8x1xf32>
    %65 = vector.broadcast %64 : vector<1x8x1xf32> to vector<1x8x8xf32>
    %66 = arith.divf %62, %65 : vector<1x8x8xf32>
    %67 = vector.extract_strided_slice %38 {offsets = [0, 0, 8], sizes = [1, 8, 8], strides = [1, 1, 1]} : vector<1x8x32xf32> to vector<1x8x8xf32>
    "tpu.trace_start"() <{level = 10 : i32, message = "bqk,bkd->bqd"}> : () -> ()
    %cst_25 = arith.constant dense<0.000000e+00> : vector<1x8x8xf32>
    %68 = tpu.matmul %66, %67, %cst_25 {dimension_numbers = #tpu.dot_dimension_numbers<[2], [1], [1], [2], [0, 0, 0, 1, 1, 2], [0], [0]>} : vector<1x8x8xf32>, vector<1x8x8xf32>, vector<1x8x8xf32> -> vector<1x8x8xf32>
    "tpu.trace_stop"() : () -> ()
    %69 = vector.shape_cast %68 : vector<1x8x8xf32> to vector<8x8xf32>
    %c0_26 = arith.constant 0 : index
    %c8 = arith.constant 8 : index
    %70 = vector.load %arg15[%c0_26, %c8] : memref<8x32xf32, #tpu.memory_space<vmem>>, vector<8x8xf32>
    tpu.vector_store %arg15[%c0_26, %c8], %69 {strides = array<i32>} : memref<8x32xf32, #tpu.memory_space<vmem>>, vector<8x8xf32>,
    %71 = vector.extract_strided_slice %34 {offsets = [0, 0, 16], sizes = [1, 8, 8], strides = [1, 1, 1]} : vector<1x8x32xf32> to vector<1x8x8xf32>
    %72 = vector.extract_strided_slice %36 {offsets = [0, 0, 16], sizes = [1, 8, 8], strides = [1, 1, 1]} : vector<1x8x32xf32> to vector<1x8x8xf32>
    "tpu.trace_start"() <{level = 10 : i32, message = "bqd,bkd->bqk"}> : () -> ()
    %cst_27 = arith.constant dense<0.000000e+00> : vector<1x8x8xf32>
    %73 = tpu.matmul %71, %72, %cst_27 {dimension_numbers = #tpu.dot_dimension_numbers<[2], [2], [1], [1], [0, 0, 0, 1, 1, 1], [0], [0]>} : vector<1x8x8xf32>, vector<1x8x8xf32>, vector<1x8x8xf32> -> vector<1x8x8xf32>
    "tpu.trace_stop"() : () -> ()
    %cst_28 = arith.constant dense<0xFF800000> : vector<1x8xf32>
    %74 = vector.multi_reduction <maximumf>, %73, %cst_28 [2] : vector<1x8x8xf32> to vector<1x8xf32>
    %75 = vector.shape_cast %74 : vector<1x8xf32> to vector<1x8x1xf32>
    %76 = vector.broadcast %75 : vector<1x8x1xf32> to vector<1x8x8xf32>
    %77 = arith.subf %73, %76 : vector<1x8x8xf32>
    %78 = math.exp %77 : vector<1x8x8xf32>
    %cst_29 = arith.constant dense<0.000000e+00> : vector<1x8xf32>
    %79 = vector.multi_reduction <add>, %78, %cst_29 [2] : vector<1x8x8xf32> to vector<1x8xf32>
    %80 = vector.shape_cast %79 : vector<1x8xf32> to vector<1x8x1xf32>
    %81 = vector.broadcast %80 : vector<1x8x1xf32> to vector<1x8x8xf32>
    %82 = arith.divf %78, %81 : vector<1x8x8xf32>
    %83 = vector.extract_strided_slice %38 {offsets = [0, 0, 16], sizes = [1, 8, 8], strides = [1, 1, 1]} : vector<1x8x32xf32> to vector<1x8x8xf32>
    "tpu.trace_start"() <{level = 10 : i32, message = "bqk,bkd->bqd"}> : () -> ()
    %cst_30 = arith.constant dense<0.000000e+00> : vector<1x8x8xf32>
    %84 = tpu.matmul %82, %83, %cst_30 {dimension_numbers = #tpu.dot_dimension_numbers<[2], [1], [1], [2], [0, 0, 0, 1, 1, 2], [0], [0]>} : vector<1x8x8xf32>, vector<1x8x8xf32>, vector<1x8x8xf32> -> vector<1x8x8xf32>
    "tpu.trace_stop"() : () -> ()
    %85 = vector.shape_cast %84 : vector<1x8x8xf32> to vector<8x8xf32>
    %c0_31 = arith.constant 0 : index
    %c16 = arith.constant 16 : index
    %86 = vector.load %arg15[%c0_31, %c16] : memref<8x32xf32, #tpu.memory_space<vmem>>, vector<8x8xf32>
    tpu.vector_store %arg15[%c0_31, %c16], %85 {strides = array<i32>} : memref<8x32xf32, #tpu.memory_space<vmem>>, vector<8x8xf32>,
    %87 = vector.extract_strided_slice %34 {offsets = [0, 0, 24], sizes = [1, 8, 8], strides = [1, 1, 1]} : vector<1x8x32xf32> to vector<1x8x8xf32>
    %88 = vector.extract_strided_slice %36 {offsets = [0, 0, 24], sizes = [1, 8, 8], strides = [1, 1, 1]} : vector<1x8x32xf32> to vector<1x8x8xf32>
    "tpu.trace_start"() <{level = 10 : i32, message = "bqd,bkd->bqk"}> : () -> ()
    %cst_32 = arith.constant dense<0.000000e+00> : vector<1x8x8xf32>
    %89 = tpu.matmul %87, %88, %cst_32 {dimension_numbers = #tpu.dot_dimension_numbers<[2], [2], [1], [1], [0, 0, 0, 1, 1, 1], [0], [0]>} : vector<1x8x8xf32>, vector<1x8x8xf32>, vector<1x8x8xf32> -> vector<1x8x8xf32>
    "tpu.trace_stop"() : () -> ()
    %cst_33 = arith.constant dense<0xFF800000> : vector<1x8xf32>
    %90 = vector.multi_reduction <maximumf>, %89, %cst_33 [2] : vector<1x8x8xf32> to vector<1x8xf32>
    %91 = vector.shape_cast %90 : vector<1x8xf32> to vector<1x8x1xf32>
    %92 = vector.broadcast %91 : vector<1x8x1xf32> to vector<1x8x8xf32>
    %93 = arith.subf %89, %92 : vector<1x8x8xf32>
    %94 = math.exp %93 : vector<1x8x8xf32>
    %cst_34 = arith.constant dense<0.000000e+00> : vector<1x8xf32>
    %95 = vector.multi_reduction <add>, %94, %cst_34 [2] : vector<1x8x8xf32> to vector<1x8xf32>
    %96 = vector.shape_cast %95 : vector<1x8xf32> to vector<1x8x1xf32>
    %97 = vector.broadcast %96 : vector<1x8x1xf32> to vector<1x8x8xf32>
    %98 = arith.divf %94, %97 : vector<1x8x8xf32>
    %99 = vector.extract_strided_slice %38 {offsets = [0, 0, 24], sizes = [1, 8, 8], strides = [1, 1, 1]} : vector<1x8x32xf32> to vector<1x8x8xf32>
    "tpu.trace_start"() <{level = 10 : i32, message = "bqk,bkd->bqd"}> : () -> ()
    %cst_35 = arith.constant dense<0.000000e+00> : vector<1x8x8xf32>
    %100 = tpu.matmul %98, %99, %cst_35 {dimension_numbers = #tpu.dot_dimension_numbers<[2], [1], [1], [2], [0, 0, 0, 1, 1, 2], [0], [0]>} : vector<1x8x8xf32>, vector<1x8x8xf32>, vector<1x8x8xf32> -> vector<1x8x8xf32>
    "tpu.trace_stop"() : () -> ()
    %101 = vector.shape_cast %100 : vector<1x8x8xf32> to vector<8x8xf32>
    %c0_36 = arith.constant 0 : index
    %c24 = arith.constant 24 : index
    %102 = vector.load %arg15[%c0_36, %c24] : memref<8x32xf32, #tpu.memory_space<vmem>>, vector<8x8xf32>
    tpu.vector_store %arg15[%c0_36, %c24], %101 {strides = array<i32>} : memref<8x32xf32, #tpu.memory_space<vmem>>, vector<8x8xf32>,
    %c0_37 = arith.constant 0 : index
    %c0_38 = arith.constant 0 : index
    %103 = vector.load %arg15[%c0_37, %c0_38] : memref<8x32xf32, #tpu.memory_space<vmem>>, vector<8x32xf32>
    %c0_39 = arith.constant 0 : index
    %c0_40 = arith.constant 0 : index
    %104 = vector.load %arg6[%c0_39, %c0_40] : memref<32x32xf32, #tpu.memory_space<vmem>>, vector<32x32xf32>
    %cst_41 = arith.constant dense<0.000000e+00> : vector<8x32xf32>
    %105 = tpu.matmul %103, %104, %cst_41 {dimension_numbers = #tpu.dot_dimension_numbers<[1], [0], [0], [1], [0, 0, 1, 1], [], []>} : vector<8x32xf32>, vector<32x32xf32>, vector<8x32xf32> -> vector<8x32xf32>
    %c0_42 = arith.constant 0 : index
    %c0_43 = arith.constant 0 : index
    %106 = vector.load %arg7[%c0_42, %c0_43] : memref<1x32xf32, #tpu.memory_space<vmem>>, vector<1x32xf32>
    %107 = vector.broadcast %106 : vector<1x32xf32> to vector<8x32xf32>
    %108 = arith.addf %105, %107 : vector<8x32xf32>
    %109 = arith.addf %1, %108 : vector<8x32xf32>
    %c0_44 = arith.constant 0 : index
    %c0_45 = arith.constant 0 : index
    %110 = vector.load %arg8[%c0_44, %c0_45] : memref<1x32xf32, #tpu.memory_space<vmem>>, vector<1x32xf32>
    %c0_46 = arith.constant 0 : index
    %c0_47 = arith.constant 0 : index
    %111 = vector.load %arg9[%c0_46, %c0_47] : memref<1x32xf32, #tpu.memory_space<vmem>>, vector<1x32xf32>
    %cst_48 = arith.constant dense<0.000000e+00> : vector<8xf32>
    %112 = vector.multi_reduction <add>, %109, %cst_48 [1] : vector<8x32xf32> to vector<8xf32>
    %113 = vector.shape_cast %112 : vector<8xf32> to vector<8x1xf32>
    %cst_49 = arith.constant 3.200000e+01 : f32
    %114 = vector.broadcast %cst_49 : f32 to vector<8x1xf32>
    %115 = arith.divf %113, %114 : vector<8x1xf32>
    %116 = vector.broadcast %115 : vector<8x1xf32> to vector<8x32xf32>
    %117 = arith.subf %109, %116 : vector<8x32xf32>
    %118 = arith.mulf %117, %117 : vector<8x32xf32>
    %cst_50 = arith.constant dense<0.000000e+00> : vector<8xf32>
    %119 = vector.multi_reduction <add>, %118, %cst_50 [1] : vector<8x32xf32> to vector<8xf32>
    %120 = vector.shape_cast %119 : vector<8xf32> to vector<8x1xf32>
    %cst_51 = arith.constant 3.200000e+01 : f32
    %121 = vector.broadcast %cst_51 : f32 to vector<8x1xf32>
    %122 = arith.divf %120, %121 : vector<8x1xf32>
    %123 = vector.broadcast %115 : vector<8x1xf32> to vector<8x32xf32>
    %124 = arith.subf %109, %123 : vector<8x32xf32>
    %cst_52 = arith.constant 9.99999974E-6 : f32
    %125 = vector.broadcast %cst_52 : f32 to vector<8x1xf32>
    %126 = arith.addf %122, %125 : vector<8x1xf32>
    %127 = math.rsqrt %126 : vector<8x1xf32>
    %128 = vector.broadcast %127 : vector<8x1xf32> to vector<8x32xf32>
    %129 = arith.mulf %124, %128 : vector<8x32xf32>
    %130 = vector.broadcast %110 : vector<1x32xf32> to vector<8x32xf32>
    %131 = arith.mulf %129, %130 : vector<8x32xf32>
    %132 = vector.broadcast %111 : vector<1x32xf32> to vector<8x32xf32>
    %133 = arith.addf %131, %132 : vector<8x32xf32>
    %c0_53 = arith.constant 0 : index
    %c0_54 = arith.constant 0 : index
    %134 = vector.load %arg10[%c0_53, %c0_54] : memref<32x128xf32, #tpu.memory_space<vmem>>, vector<32x128xf32>
    %cst_55 = arith.constant dense<0.000000e+00> : vector<8x128xf32>
    %135 = tpu.matmul %133, %134, %cst_55 {dimension_numbers = #tpu.dot_dimension_numbers<[1], [0], [0], [1], [0, 0, 1, 1], [], []>} : vector<8x32xf32>, vector<32x128xf32>, vector<8x128xf32> -> vector<8x128xf32>
    %c0_56 = arith.constant 0 : index
    %c0_57 = arith.constant 0 : index
    %136 = vector.load %arg11[%c0_56, %c0_57] : memref<1x128xf32, #tpu.memory_space<vmem>>, vector<1x128xf32>
    %137 = vector.broadcast %136 : vector<1x128xf32> to vector<8x128xf32>
    %138 = arith.addf %135, %137 : vector<8x128xf32>
    %cst_58 = arith.constant 1.702000e+00 : f32
    %139 = vector.broadcast %cst_58 : f32 to vector<8x128xf32>
    %140 = arith.mulf %139, %138 : vector<8x128xf32>
    %141 = arith.negf %140 : vector<8x128xf32>
    %142 = math.exp %141 : vector<8x128xf32>
    %cst_59 = arith.constant 1.000000e+00 : f32
    %143 = vector.broadcast %cst_59 : f32 to vector<8x128xf32>
    %144 = arith.addf %143, %142 : vector<8x128xf32>
    %145 = arith.divf %143, %144 : vector<8x128xf32>
    %146 = arith.mulf %138, %145 : vector<8x128xf32>
    %c0_60 = arith.constant 0 : index
    %c0_61 = arith.constant 0 : index
    %147 = vector.load %arg12[%c0_60, %c0_61] : memref<128x32xf32, #tpu.memory_space<vmem>>, vector<128x32xf32>
    %cst_62 = arith.constant dense<0.000000e+00> : vector<8x32xf32>
    %148 = tpu.matmul %146, %147, %cst_62 {dimension_numbers = #tpu.dot_dimension_numbers<[1], [0], [0], [1], [0, 0, 1, 1], [], []>} : vector<8x128xf32>, vector<128x32xf32>, vector<8x32xf32> -> vector<8x32xf32>
    %c0_63 = arith.constant 0 : index
    %c0_64 = arith.constant 0 : index
    %149 = vector.load %arg13[%c0_63, %c0_64] : memref<1x32xf32, #tpu.memory_space<vmem>>, vector<1x32xf32>
    %150 = vector.broadcast %149 : vector<1x32xf32> to vector<8x32xf32>
    %151 = arith.addf %148, %150 : vector<8x32xf32>
    %152 = arith.addf %109, %151 : vector<8x32xf32>
    %153 = vector.shape_cast %152 : vector<8x32xf32> to vector<1x8x32xf32>
    %c0_65 = arith.constant 0 : index
    %c0_66 = arith.constant 0 : index
    %c0_67 = arith.constant 0 : index
    %154 = vector.load %arg14[%c0_65, %c0_66, %c0_67] : memref<1x8x32xf32, #tpu.memory_space<vmem>>, vector<1x8x32xf32>
    tpu.vector_store %arg14[%c0_65, %c0_66, %c0_67], %153 {strides = array<i32>} : memref<1x8x32xf32, #tpu.memory_space<vmem>>, vector<1x8x32xf32>,
    return
  }
  func.func @transform_0(%arg0: i32) -> (i32, i32, i32) {
    %c0_i32 = arith.constant 0 : i32
    %c0_i32_0 = arith.constant 0 : i32
    %c0_i32_1 = arith.constant 0 : i32
    return %arg0, %c0_i32, %c0_i32_0 : i32, i32, i32
  }
  func.func @transform_1(%arg0: i32) -> (i32, i32) {
    %c0_i32 = arith.constant 0 : i32
    %c0_i32_0 = arith.constant 0 : i32
    %c0_i32_1 = arith.constant 0 : i32
    return %c0_i32, %c0_i32_0 : i32, i32
  }
  func.func @transform_2(%arg0: i32) -> (i32, i32) {
    %c0_i32 = arith.constant 0 : i32
    %c0_i32_0 = arith.constant 0 : i32
    %c0_i32_1 = arith.constant 0 : i32
    return %c0_i32, %c0_i32_0 : i32, i32
  }
  func.func @transform_3(%arg0: i32) -> (i32, i32) {
    %c0_i32 = arith.constant 0 : i32
    %c0_i32_0 = arith.constant 0 : i32
    %c0_i32_1 = arith.constant 0 : i32
    return %c0_i32, %c0_i32_0 : i32, i32
  }
  func.func @transform_4(%arg0: i32) -> (i32, i32) {
    %c0_i32 = arith.constant 0 : i32
    %c0_i32_0 = arith.constant 0 : i32
    %c0_i32_1 = arith.constant 0 : i32
    return %c0_i32, %c0_i32_0 : i32, i32
  }
  func.func @transform_5(%arg0: i32) -> (i32, i32) {
    %c0_i32 = arith.constant 0 : i32
    %c0_i32_0 = arith.constant 0 : i32
    %c0_i32_1 = arith.constant 0 : i32
    return %c0_i32, %c0_i32_0 : i32, i32
  }
  func.func @transform_6(%arg0: i32) -> (i32, i32) {
    %c0_i32 = arith.constant 0 : i32
    %c0_i32_0 = arith.constant 0 : i32
    %c0_i32_1 = arith.constant 0 : i32
    return %c0_i32, %c0_i32_0 : i32, i32
  }
  func.func @transform_7(%arg0: i32) -> (i32, i32) {
    %c0_i32 = arith.constant 0 : i32
    %c0_i32_0 = arith.constant 0 : i32
    %c0_i32_1 = arith.constant 0 : i32
    return %c0_i32, %c0_i32_0 : i32, i32
  }
  func.func @transform_8(%arg0: i32) -> (i32, i32) {
    %c0_i32 = arith.constant 0 : i32
    %c0_i32_0 = arith.constant 0 : i32
    %c0_i32_1 = arith.constant 0 : i32
    return %c0_i32, %c0_i32_0 : i32, i32
  }
  func.func @transform_9(%arg0: i32) -> (i32, i32) {
    %c0_i32 = arith.constant 0 : i32
    %c0_i32_0 = arith.constant 0 : i32
    %c0_i32_1 = arith.constant 0 : i32
    return %c0_i32, %c0_i32_0 : i32, i32
  }
  func.func @transform_10(%arg0: i32) -> (i32, i32) {
    %c0_i32 = arith.constant 0 : i32
    %c0_i32_0 = arith.constant 0 : i32
    %c0_i32_1 = arith.constant 0 : i32
    return %c0_i32, %c0_i32_0 : i32, i32
  }
  func.func @transform_11(%arg0: i32) -> (i32, i32) {
    %c0_i32 = arith.constant 0 : i32
    %c0_i32_0 = arith.constant 0 : i32
    %c0_i32_1 = arith.constant 0 : i32
    return %c0_i32, %c0_i32_0 : i32, i32
  }
  func.func @transform_12(%arg0: i32) -> (i32, i32) {
    %c0_i32 = arith.constant 0 : i32
    %c0_i32_0 = arith.constant 0 : i32
    %c0_i32_1 = arith.constant 0 : i32
    return %c0_i32, %c0_i32_0 : i32, i32
  }
  func.func @transform_13(%arg0: i32) -> (i32, i32, i32) {
    %c0_i32 = arith.constant 0 : i32
    %c0_i32_0 = arith.constant 0 : i32
    %c0_i32_1 = arith.constant 0 : i32
    return %arg0, %c0_i32, %c0_i32_0 : i32, i32, i32
  }
}

module attributes {stable_mosaic.version = 11 : i64} {
  func.func @residual_attention_block_kernel(%arg0: i32, %arg1: memref<1x8x32xf32, #tpu.memory_space<vmem>>, %arg2: memref<1x32xf32, #tpu.memory_space<vmem>>, %arg3: memref<1x32xf32, #tpu.memory_space<vmem>>, %arg4: memref<32x96xf32, #tpu.memory_space<vmem>>, %arg5: memref<1x96xf32, #tpu.memory_space<vmem>>, %arg6: memref<32x32xf32, #tpu.memory_space<vmem>>, %arg7: memref<1x32xf32, #tpu.memory_space<vmem>>, %arg8: memref<1x32xf32, #tpu.memory_space<vmem>>, %arg9: memref<1x32xf32, #tpu.memory_space<vmem>>, %arg10: memref<32x128xf32, #tpu.memory_space<vmem>>, %arg11: memref<1x128xf32, #tpu.memory_space<vmem>>, %arg12: memref<128x32xf32, #tpu.memory_space<vmem>>, %arg13: memref<1x32xf32, #tpu.memory_space<vmem>>, %arg14: memref<1x8x32xf32, #tpu.memory_space<vmem>>, %arg15: memref<8x32xf32, #tpu.memory_space<vmem>>) attributes {dimension_semantics = [#tpu.dimension_semantics<parallel>], iteration_bounds = array<i64: 2>, scalar_prefetch = 0 : i64, scratch_operands = 1 : i64, tpu.core_type = #tpu.core_type<tc>, window_params = [{transform_indices = @transform_0, window_bounds = array<i64: 1, 8, 32>}, {pipeline_mode = #tpu.pipeline_mode<synchronous>, transform_indices = @transform_1, window_bounds = array<i64: 1, 32>}, {pipeline_mode = #tpu.pipeline_mode<synchronous>, transform_indices = @transform_2, window_bounds = array<i64: 1, 32>}, {pipeline_mode = #tpu.pipeline_mode<synchronous>, transform_indices = @transform_3, window_bounds = array<i64: 32, 96>}, {pipeline_mode = #tpu.pipeline_mode<synchronous>, transform_indices = @transform_4, window_bounds = array<i64: 1, 96>}, {pipeline_mode = #tpu.pipeline_mode<synchronous>, transform_indices = @transform_5, window_bounds = array<i64: 32, 32>}, {pipeline_mode = #tpu.pipeline_mode<synchronous>, transform_indices = @transform_6, window_bounds = array<i64: 1, 32>}, {pipeline_mode = #tpu.pipeline_mode<synchronous>, transform_indices = @transform_7, window_bounds = array<i64: 1, 32>}, {pipeline_mode = #tpu.pipeline_mode<synchronous>, transform_indices = @transform_8, window_bounds = array<i64: 1, 32>}, {pipeline_mode = #tpu.pipeline_mode<synchronous>, transform_indices = @transform_9, window_bounds = array<i64: 32, 128>}, {pipeline_mode = #tpu.pipeline_mode<synchronous>, transform_indices = @transform_10, window_bounds = array<i64: 1, 128>}, {pipeline_mode = #tpu.pipeline_mode<synchronous>, transform_indices = @transform_11, window_bounds = array<i64: 128, 32>}, {pipeline_mode = #tpu.pipeline_mode<synchronous>, transform_indices = @transform_12, window_bounds = array<i64: 1, 32>}, {transform_indices = @transform_13, window_bounds = array<i64: 1, 8, 32>}]} {
    %c0 = arith.constant 0 : index
    %c0_0 = arith.constant 0 : index
    %c0_1 = arith.constant 0 : index
    %0 = vector.load %arg1[%c0, %c0_0, %c0_1] : memref<1x8x32xf32, #tpu.memory_space<vmem>>, vector<1x8x32xf32>
    %1 = vector.shape_cast %0 : vector<1x8x32xf32> to vector<8x32xf32>
    %c0_2 = arith.constant 0 : index
    %c0_3 = arith.constant 0 : index
    %2 = vector.load %arg2[%c0_2, %c0_3] : memref<1x32xf32, #tpu.memory_space<vmem>>, vector<1x32xf32>
    %c0_4 = arith.constant 0 : index
    %c0_5 = arith.constant 0 : index
    %3 = vector.load %arg3[%c0_4, %c0_5] : memref<1x32xf32, #tpu.memory_space<vmem>>, vector<1x32xf32>
    %cst = arith.constant dense<0.000000e+00> : vector<8xf32>
    %4 = vector.multi_reduction <add>, %1, %cst [1] : vector<8x32xf32> to vector<8xf32>
    %5 = vector.shape_cast %4 : vector<8xf32> to vector<8x1xf32>
    %cst_6 = arith.constant 3.200000e+01 : f32
    %6 = vector.broadcast %cst_6 : f32 to vector<8x1xf32>
    %7 = arith.divf %5, %6 : vector<8x1xf32>
    %8 = vector.broadcast %7 : vector<8x1xf32> to vector<8x32xf32>
    %9 = arith.subf %1, %8 : vector<8x32xf32>
    %10 = arith.mulf %9, %9 : vector<8x32xf32>
    %cst_7 = arith.constant dense<0.000000e+00> : vector<8xf32>
    %11 = vector.multi_reduction <add>, %10, %cst_7 [1] : vector<8x32xf32> to vector<8xf32>
    %12 = vector.shape_cast %11 : vector<8xf32> to vector<8x1xf32>
    %cst_8 = arith.constant 3.200000e+01 : f32
    %13 = vector.broadcast %cst_8 : f32 to vector<8x1xf32>
    %14 = arith.divf %12, %13 : vector<8x1xf32>
    %15 = vector.broadcast %7 : vector<8x1xf32> to vector<8x32xf32>
    %16 = arith.subf %1, %15 : vector<8x32xf32>
    %cst_9 = arith.constant 9.99999974E-6 : f32
    %17 = vector.broadcast %cst_9 : f32 to vector<8x1xf32>
    %18 = arith.addf %14, %17 : vector<8x1xf32>
    %19 = math.rsqrt %18 : vector<8x1xf32>
    %20 = vector.broadcast %19 : vector<8x1xf32> to vector<8x32xf32>
    %21 = arith.mulf %16, %20 : vector<8x32xf32>
    %22 = vector.broadcast %2 : vector<1x32xf32> to vector<8x32xf32>
    %23 = arith.mulf %21, %22 : vector<8x32xf32>
    %24 = vector.broadcast %3 : vector<1x32xf32> to vector<8x32xf32>
    %25 = arith.addf %23, %24 : vector<8x32xf32>
    %c0_10 = arith.constant 0 : index
    %c0_11 = arith.constant 0 : index
    %26 = vector.load %arg4[%c0_10, %c0_11] : memref<32x96xf32, #tpu.memory_space<vmem>>, vector<32x96xf32>
    %cst_12 = arith.constant dense<0.000000e+00> : vector<8x96xf32>
    %27 = tpu.matmul %25, %26, %cst_12 {dimension_numbers = #tpu.dot_dimension_numbers<[1], [0], [0], [1], [0, 0, 1, 1], [], []>} : vector<8x32xf32>, vector<32x96xf32>, vector<8x96xf32> -> vector<8x96xf32>
    %c0_13 = arith.constant 0 : index
    %c0_14 = arith.constant 0 : index
    %28 = vector.load %arg5[%c0_13, %c0_14] : memref<1x96xf32, #tpu.memory_space<vmem>>, vector<1x96xf32>
    %29 = vector.broadcast %28 : vector<1x96xf32> to vector<8x96xf32>
    %30 = arith.addf %27, %29 : vector<8x96xf32>
    %31 = vector.extract_strided_slice %30 {offsets = [0, 0], sizes = [8, 32], strides = [1, 1]} : vector<8x96xf32> to vector<8x32xf32>
    %cst_15 = arith.constant 0.353553385 : f32
    %32 = vector.broadcast %cst_15 : f32 to vector<8x32xf32>
    %33 = arith.mulf %31, %32 : vector<8x32xf32>
    %34 = vector.shape_cast %33 : vector<8x32xf32> to vector<1x8x32xf32>
    %35 = vector.extract_strided_slice %30 {offsets = [0, 32], sizes = [8, 32], strides = [1, 1]} : vector<8x96xf32> to vector<8x32xf32>
    %36 = vector.shape_cast %35 : vector<8x32xf32> to vector<1x8x32xf32>
    %37 = vector.extract_strided_slice %30 {offsets = [0, 64], sizes = [8, 32], strides = [1, 1]} : vector<8x96xf32> to vector<8x32xf32>
    %38 = vector.shape_cast %37 : vector<8x32xf32> to vector<1x8x32xf32>
    %39 = vector.extract_strided_slice %34 {offsets = [0, 0, 0], sizes = [1, 8, 8], strides = [1, 1, 1]} : vector<1x8x32xf32> to vector<1x8x8xf32>
    %40 = vector.extract_strided_slice %36 {offsets = [0, 0, 0], sizes = [1, 8, 8], strides = [1, 1, 1]} : vector<1x8x32xf32> to vector<1x8x8xf32>
    "tpu.trace_start"() <{level = 10 : i32, message = "bqd,bkd->bqk"}> : () -> ()
    %cst_16 = arith.constant dense<0.000000e+00> : vector<1x8x8xf32>
    %41 = tpu.matmul %39, %40, %cst_16 {dimension_numbers = #tpu.dot_dimension_numbers<[2], [2], [1], [1], [0, 0, 0, 1, 1, 1], [0], [0]>} : vector<1x8x8xf32>, vector<1x8x8xf32>, vector<1x8x8xf32> -> vector<1x8x8xf32>
    "tpu.trace_stop"() : () -> ()
    %cst_17 = arith.constant dense<0xFF800000> : vector<1x8xf32>
    %42 = vector.multi_reduction <maximumf>, %41, %cst_17 [2] : vector<1x8x8xf32> to vector<1x8xf32>
    %43 = vector.shape_cast %42 : vector<1x8xf32> to vector<1x8x1xf32>
    %44 = vector.broadcast %43 : vector<1x8x1xf32> to vector<1x8x8xf32>
    %45 = arith.subf %41, %44 : vector<1x8x8xf32>
    %46 = math.exp %45 : vector<1x8x8xf32>
    %cst_18 = arith.constant dense<0.000000e+00> : vector<1x8xf32>
    %47 = vector.multi_reduction <add>, %46, %cst_18 [2] : vector<1x8x8xf32> to vector<1x8xf32>
    %48 = vector.shape_cast %47 : vector<1x8xf32> to vector<1x8x1xf32>
    %49 = vector.broadcast %48 : vector<1x8x1xf32> to vector<1x8x8xf32>
    %50 = arith.divf %46, %49 : vector<1x8x8xf32>
    %51 = vector.extract_strided_slice %38 {offsets = [0, 0, 0], sizes = [1, 8, 8], strides = [1, 1, 1]} : vector<1x8x32xf32> to vector<1x8x8xf32>
    "tpu.trace_start"() <{level = 10 : i32, message = "bqk,bkd->bqd"}> : () -> ()
    %cst_19 = arith.constant dense<0.000000e+00> : vector<1x8x8xf32>
    %52 = tpu.matmul %50, %51, %cst_19 {dimension_numbers = #tpu.dot_dimension_numbers<[2], [1], [1], [2], [0, 0, 0, 1, 1, 2], [0], [0]>} : vector<1x8x8xf32>, vector<1x8x8xf32>, vector<1x8x8xf32> -> vector<1x8x8xf32>
    "tpu.trace_stop"() : () -> ()
    %53 = vector.shape_cast %52 : vector<1x8x8xf32> to vector<8x8xf32>
    %c0_20 = arith.constant 0 : index
    %c0_21 = arith.constant 0 : index
    %54 = vector.load %arg15[%c0_20, %c0_21] : memref<8x32xf32, #tpu.memory_space<vmem>>, vector<8x8xf32>
    tpu.vector_store %arg15[%c0_20, %c0_21], %53 {strides = array<i32>} : memref<8x32xf32, #tpu.memory_space<vmem>>, vector<8x8xf32>,
    %55 = vector.extract_strided_slice %34 {offsets = [0, 0, 8], sizes = [1, 8, 8], strides = [1, 1, 1]} : vector<1x8x32xf32> to vector<1x8x8xf32>
    %56 = vector.extract_strided_slice %36 {offsets = [0, 0, 8], sizes = [1, 8, 8], strides = [1, 1, 1]} : vector<1x8x32xf32> to vector<1x8x8xf32>
    "tpu.trace_start"() <{level = 10 : i32, message = "bqd,bkd->bqk"}> : () -> ()
    %cst_22 = arith.constant dense<0.000000e+00> : vector<1x8x8xf32>
    %57 = tpu.matmul %55, %56, %cst_22 {dimension_numbers = #tpu.dot_dimension_numbers<[2], [2], [1], [1], [0, 0, 0, 1, 1, 1], [0], [0]>} : vector<1x8x8xf32>, vector<1x8x8xf32>, vector<1x8x8xf32> -> vector<1x8x8xf32>
    "tpu.trace_stop"() : () -> ()
    %cst_23 = arith.constant dense<0xFF800000> : vector<1x8xf32>
    %58 = vector.multi_reduction <maximumf>, %57, %cst_23 [2] : vector<1x8x8xf32> to vector<1x8xf32>
    %59 = vector.shape_cast %58 : vector<1x8xf32> to vector<1x8x1xf32>
    %60 = vector.broadcast %59 : vector<1x8x1xf32> to vector<1x8x8xf32>
    %61 = arith.subf %57, %60 : vector<1x8x8xf32>
    %62 = math.exp %61 : vector<1x8x8xf32>
    %cst_24 = arith.constant dense<0.000000e+00> : vector<1x8xf32>
    %63 = vector.multi_reduction <add>, %62, %cst_24 [2] : vector<1x8x8xf32> to vector<1x8xf32>
    %64 = vector.shape_cast %63 : vector<1x8xf32> to vector<1x8x1xf32>
    %65 = vector.broadcast %64 : vector<1x8x1xf32> to vector<1x8x8xf32>
    %66 = arith.divf %62, %65 : vector<1x8x8xf32>
    %67 = vector.extract_strided_slice %38 {offsets = [0, 0, 8], sizes = [1, 8, 8], strides = [1, 1, 1]} : vector<1x8x32xf32> to vector<1x8x8xf32>
    "tpu.trace_start"() <{level = 10 : i32, message = "bqk,bkd->bqd"}> : () -> ()
    %cst_25 = arith.constant dense<0.000000e+00> : vector<1x8x8xf32>
    %68 = tpu.matmul %66, %67, %cst_25 {dimension_numbers = #tpu.dot_dimension_numbers<[2], [1], [1], [2], [0, 0, 0, 1, 1, 2], [0], [0]>} : vector<1x8x8xf32>, vector<1x8x8xf32>, vector<1x8x8xf32> -> vector<1x8x8xf32>
    "tpu.trace_stop"() : () -> ()
    %69 = vector.shape_cast %68 : vector<1x8x8xf32> to vector<8x8xf32>
    %c0_26 = arith.constant 0 : index
    %c8 = arith.constant 8 : index
    %70 = vector.load %arg15[%c0_26, %c8] : memref<8x32xf32, #tpu.memory_space<vmem>>, vector<8x8xf32>
    tpu.vector_store %arg15[%c0_26, %c8], %69 {strides = array<i32>} : memref<8x32xf32, #tpu.memory_space<vmem>>, vector<8x8xf32>,
    %71 = vector.extract_strided_slice %34 {offsets = [0, 0, 16], sizes = [1, 8, 8], strides = [1, 1, 1]} : vector<1x8x32xf32> to vector<1x8x8xf32>
    %72 = vector.extract_strided_slice %36 {offsets = [0, 0, 16], sizes = [1, 8, 8], strides = [1, 1, 1]} : vector<1x8x32xf32> to vector<1x8x8xf32>
    "tpu.trace_start"() <{level = 10 : i32, message = "bqd,bkd->bqk"}> : () -> ()
    %cst_27 = arith.constant dense<0.000000e+00> : vector<1x8x8xf32>
    %73 = tpu.matmul %71, %72, %cst_27 {dimension_numbers = #tpu.dot_dimension_numbers<[2], [2], [1], [1], [0, 0, 0, 1, 1, 1], [0], [0]>} : vector<1x8x8xf32>, vector<1x8x8xf32>, vector<1x8x8xf32> -> vector<1x8x8xf32>
    "tpu.trace_stop"() : () -> ()
    %cst_28 = arith.constant dense<0xFF800000> : vector<1x8xf32>
    %74 = vector.multi_reduction <maximumf>, %73, %cst_28 [2] : vector<1x8x8xf32> to vector<1x8xf32>
    %75 = vector.shape_cast %74 : vector<1x8xf32> to vector<1x8x1xf32>
    %76 = vector.broadcast %75 : vector<1x8x1xf32> to vector<1x8x8xf32>
    %77 = arith.subf %73, %76 : vector<1x8x8xf32>
    %78 = math.exp %77 : vector<1x8x8xf32>
    %cst_29 = arith.constant dense<0.000000e+00> : vector<1x8xf32>
    %79 = vector.multi_reduction <add>, %78, %cst_29 [2] : vector<1x8x8xf32> to vector<1x8xf32>
    %80 = vector.shape_cast %79 : vector<1x8xf32> to vector<1x8x1xf32>
    %81 = vector.broadcast %80 : vector<1x8x1xf32> to vector<1x8x8xf32>
    %82 = arith.divf %78, %81 : vector<1x8x8xf32>
    %83 = vector.extract_strided_slice %38 {offsets = [0, 0, 16], sizes = [1, 8, 8], strides = [1, 1, 1]} : vector<1x8x32xf32> to vector<1x8x8xf32>
    "tpu.trace_start"() <{level = 10 : i32, message = "bqk,bkd->bqd"}> : () -> ()
    %cst_30 = arith.constant dense<0.000000e+00> : vector<1x8x8xf32>
    %84 = tpu.matmul %82, %83, %cst_30 {dimension_numbers = #tpu.dot_dimension_numbers<[2], [1], [1], [2], [0, 0, 0, 1, 1, 2], [0], [0]>} : vector<1x8x8xf32>, vector<1x8x8xf32>, vector<1x8x8xf32> -> vector<1x8x8xf32>
    "tpu.trace_stop"() : () -> ()
    %85 = vector.shape_cast %84 : vector<1x8x8xf32> to vector<8x8xf32>
    %c0_31 = arith.constant 0 : index
    %c16 = arith.constant 16 : index
    %86 = vector.load %arg15[%c0_31, %c16] : memref<8x32xf32, #tpu.memory_space<vmem>>, vector<8x8xf32>
    tpu.vector_store %arg15[%c0_31, %c16], %85 {strides = array<i32>} : memref<8x32xf32, #tpu.memory_space<vmem>>, vector<8x8xf32>,
    %87 = vector.extract_strided_slice %34 {offsets = [0, 0, 24], sizes = [1, 8, 8], strides = [1, 1, 1]} : vector<1x8x32xf32> to vector<1x8x8xf32>
    %88 = vector.extract_strided_slice %36 {offsets = [0, 0, 24], sizes = [1, 8, 8], strides = [1, 1, 1]} : vector<1x8x32xf32> to vector<1x8x8xf32>
    "tpu.trace_start"() <{level = 10 : i32, message = "bqd,bkd->bqk"}> : () -> ()
    %cst_32 = arith.constant dense<0.000000e+00> : vector<1x8x8xf32>
    %89 = tpu.matmul %87, %88, %cst_32 {dimension_numbers = #tpu.dot_dimension_numbers<[2], [2], [1], [1], [0, 0, 0, 1, 1, 1], [0], [0]>} : vector<1x8x8xf32>, vector<1x8x8xf32>, vector<1x8x8xf32> -> vector<1x8x8xf32>
    "tpu.trace_stop"() : () -> ()
    %cst_33 = arith.constant dense<0xFF800000> : vector<1x8xf32>
    %90 = vector.multi_reduction <maximumf>, %89, %cst_33 [2] : vector<1x8x8xf32> to vector<1x8xf32>
    %91 = vector.shape_cast %90 : vector<1x8xf32> to vector<1x8x1xf32>
    %92 = vector.broadcast %91 : vector<1x8x1xf32> to vector<1x8x8xf32>
    %93 = arith.subf %89, %92 : vector<1x8x8xf32>
    %94 = math.exp %93 : vector<1x8x8xf32>
    %cst_34 = arith.constant dense<0.000000e+00> : vector<1x8xf32>
    %95 = vector.multi_reduction <add>, %94, %cst_34 [2] : vector<1x8x8xf32> to vector<1x8xf32>
    %96 = vector.shape_cast %95 : vector<1x8xf32> to vector<1x8x1xf32>
    %97 = vector.broadcast %96 : vector<1x8x1xf32> to vector<1x8x8xf32>
    %98 = arith.divf %94, %97 : vector<1x8x8xf32>
    %99 = vector.extract_strided_slice %38 {offsets = [0, 0, 24], sizes = [1, 8, 8], strides = [1, 1, 1]} : vector<1x8x32xf32> to vector<1x8x8xf32>
    "tpu.trace_start"() <{level = 10 : i32, message = "bqk,bkd->bqd"}> : () -> ()
    %cst_35 = arith.constant dense<0.000000e+00> : vector<1x8x8xf32>
    %100 = tpu.matmul %98, %99, %cst_35 {dimension_numbers = #tpu.dot_dimension_numbers<[2], [1], [1], [2], [0, 0, 0, 1, 1, 2], [0], [0]>} : vector<1x8x8xf32>, vector<1x8x8xf32>, vector<1x8x8xf32> -> vector<1x8x8xf32>
    "tpu.trace_stop"() : () -> ()
    %101 = vector.shape_cast %100 : vector<1x8x8xf32> to vector<8x8xf32>
    %c0_36 = arith.constant 0 : index
    %c24 = arith.constant 24 : index
    %102 = vector.load %arg15[%c0_36, %c24] : memref<8x32xf32, #tpu.memory_space<vmem>>, vector<8x8xf32>
    tpu.vector_store %arg15[%c0_36, %c24], %101 {strides = array<i32>} : memref<8x32xf32, #tpu.memory_space<vmem>>, vector<8x8xf32>,
    %c0_37 = arith.constant 0 : index
    %c0_38 = arith.constant 0 : index
    %103 = vector.load %arg15[%c0_37, %c0_38] : memref<8x32xf32, #tpu.memory_space<vmem>>, vector<8x32xf32>
    %c0_39 = arith.constant 0 : index
    %c0_40 = arith.constant 0 : index
    %104 = vector.load %arg6[%c0_39, %c0_40] : memref<32x32xf32, #tpu.memory_space<vmem>>, vector<32x32xf32>
    %cst_41 = arith.constant dense<0.000000e+00> : vector<8x32xf32>
    %105 = tpu.matmul %103, %104, %cst_41 {dimension_numbers = #tpu.dot_dimension_numbers<[1], [0], [0], [1], [0, 0, 1, 1], [], []>} : vector<8x32xf32>, vector<32x32xf32>, vector<8x32xf32> -> vector<8x32xf32>
    %c0_42 = arith.constant 0 : index
    %c0_43 = arith.constant 0 : index
    %106 = vector.load %arg7[%c0_42, %c0_43] : memref<1x32xf32, #tpu.memory_space<vmem>>, vector<1x32xf32>
    %107 = vector.broadcast %106 : vector<1x32xf32> to vector<8x32xf32>
    %108 = arith.addf %105, %107 : vector<8x32xf32>
    %109 = arith.addf %1, %108 : vector<8x32xf32>
    %c0_44 = arith.constant 0 : index
    %c0_45 = arith.constant 0 : index
    %110 = vector.load %arg8[%c0_44, %c0_45] : memref<1x32xf32, #tpu.memory_space<vmem>>, vector<1x32xf32>
    %c0_46 = arith.constant 0 : index
    %c0_47 = arith.constant 0 : index
    %111 = vector.load %arg9[%c0_46, %c0_47] : memref<1x32xf32, #tpu.memory_space<vmem>>, vector<1x32xf32>
    %cst_48 = arith.constant dense<0.000000e+00> : vector<8xf32>
    %112 = vector.multi_reduction <add>, %109, %cst_48 [1] : vector<8x32xf32> to vector<8xf32>
    %113 = vector.shape_cast %112 : vector<8xf32> to vector<8x1xf32>
    %cst_49 = arith.constant 3.200000e+01 : f32
    %114 = vector.broadcast %cst_49 : f32 to vector<8x1xf32>
    %115 = arith.divf %113, %114 : vector<8x1xf32>
    %116 = vector.broadcast %115 : vector<8x1xf32> to vector<8x32xf32>
    %117 = arith.subf %109, %116 : vector<8x32xf32>
    %118 = arith.mulf %117, %117 : vector<8x32xf32>
    %cst_50 = arith.constant dense<0.000000e+00> : vector<8xf32>
    %119 = vector.multi_reduction <add>, %118, %cst_50 [1] : vector<8x32xf32> to vector<8xf32>
    %120 = vector.shape_cast %119 : vector<8xf32> to vector<8x1xf32>
    %cst_51 = arith.constant 3.200000e+01 : f32
    %121 = vector.broadcast %cst_51 : f32 to vector<8x1xf32>
    %122 = arith.divf %120, %121 : vector<8x1xf32>
    %123 = vector.broadcast %115 : vector<8x1xf32> to vector<8x32xf32>
    %124 = arith.subf %109, %123 : vector<8x32xf32>
    %cst_52 = arith.constant 9.99999974E-6 : f32
    %125 = vector.broadcast %cst_52 : f32 to vector<8x1xf32>
    %126 = arith.addf %122, %125 : vector<8x1xf32>
    %127 = math.rsqrt %126 : vector<8x1xf32>
    %128 = vector.broadcast %127 : vector<8x1xf32> to vector<8x32xf32>
    %129 = arith.mulf %124, %128 : vector<8x32xf32>
    %130 = vector.broadcast %110 : vector<1x32xf32> to vector<8x32xf32>
    %131 = arith.mulf %129, %130 : vector<8x32xf32>
    %132 = vector.broadcast %111 : vector<1x32xf32> to vector<8x32xf32>
    %133 = arith.addf %131, %132 : vector<8x32xf32>
    %c0_53 = arith.constant 0 : index
    %c0_54 = arith.constant 0 : index
    %134 = vector.load %arg10[%c0_53, %c0_54] : memref<32x128xf32, #tpu.memory_space<vmem>>, vector<32x128xf32>
    %cst_55 = arith.constant dense<0.000000e+00> : vector<8x128xf32>
    %135 = tpu.matmul %133, %134, %cst_55 {dimension_numbers = #tpu.dot_dimension_numbers<[1], [0], [0], [1], [0, 0, 1, 1], [], []>} : vector<8x32xf32>, vector<32x128xf32>, vector<8x128xf32> -> vector<8x128xf32>
    %c0_56 = arith.constant 0 : index
    %c0_57 = arith.constant 0 : index
    %136 = vector.load %arg11[%c0_56, %c0_57] : memref<1x128xf32, #tpu.memory_space<vmem>>, vector<1x128xf32>
    %137 = vector.broadcast %136 : vector<1x128xf32> to vector<8x128xf32>
    %138 = arith.addf %135, %137 : vector<8x128xf32>
    %cst_58 = arith.constant 1.702000e+00 : f32
    %139 = vector.broadcast %cst_58 : f32 to vector<8x128xf32>
    %140 = arith.mulf %139, %138 : vector<8x128xf32>
    %141 = arith.negf %140 : vector<8x128xf32>
    %142 = math.exp %141 : vector<8x128xf32>
    %cst_59 = arith.constant 1.000000e+00 : f32
    %143 = vector.broadcast %cst_59 : f32 to vector<8x128xf32>
    %144 = arith.addf %143, %142 : vector<8x128xf32>
    %145 = arith.divf %143, %144 : vector<8x128xf32>
    %146 = arith.mulf %138, %145 : vector<8x128xf32>
    %c0_60 = arith.constant 0 : index
    %c0_61 = arith.constant 0 : index
    %147 = vector.load %arg12[%c0_60, %c0_61] : memref<128x32xf32, #tpu.memory_space<vmem>>, vector<128x32xf32>
    %cst_62 = arith.constant dense<0.000000e+00> : vector<8x32xf32>
    %148 = tpu.matmul %146, %147, %cst_62 {dimension_numbers = #tpu.dot_dimension_numbers<[1], [0], [0], [1], [0, 0, 1, 1], [], []>} : vector<8x128xf32>, vector<128x32xf32>, vector<8x32xf32> -> vector<8x32xf32>
    %c0_63 = arith.constant 0 : index
    %c0_64 = arith.constant 0 : index
    %149 = vector.load %arg13[%c0_63, %c0_64] : memref<1x32xf32, #tpu.memory_space<vmem>>, vector<1x32xf32>
    %150 = vector.broadcast %149 : vector<1x32xf32> to vector<8x32xf32>
    %151 = arith.addf %148, %150 : vector<8x32xf32>
    %152 = arith.addf %109, %151 : vector<8x32xf32>
    %153 = vector.shape_cast %152 : vector<8x32xf32> to vector<1x8x32xf32>
    %c0_65 = arith.constant 0 : index
    %c0_66 = arith.constant 0 : index
    %c0_67 = arith.constant 0 : index
    %154 = vector.load %arg14[%c0_65, %c0_66, %c0_67] : memref<1x8x32xf32, #tpu.memory_space<vmem>>, vector<1x8x32xf32>
    tpu.vector_store %arg14[%c0_65, %c0_66, %c0_67], %153 {strides = array<i32>} : memref<1x8x32xf32, #tpu.memory_space<vmem>>, vector<1x8x32xf32>,
    return
  }
  func.func @transform_0(%arg0: i32) -> (i32, i32, i32) {
    %c0_i32 = arith.constant 0 : i32
    %c0_i32_0 = arith.constant 0 : i32
    %c0_i32_1 = arith.constant 0 : i32
    return %arg0, %c0_i32, %c0_i32_0 : i32, i32, i32
  }
  func.func @transform_1(%arg0: i32) -> (i32, i32) {
    %c0_i32 = arith.constant 0 : i32
    %c0_i32_0 = arith.constant 0 : i32
    %c0_i32_1 = arith.constant 0 : i32
    return %c0_i32, %c0_i32_0 : i32, i32
  }
  func.func @transform_2(%arg0: i32) -> (i32, i32) {
    %c0_i32 = arith.constant 0 : i32
    %c0_i32_0 = arith.constant 0 : i32
    %c0_i32_1 = arith.constant 0 : i32
    return %c0_i32, %c0_i32_0 : i32, i32
  }
  func.func @transform_3(%arg0: i32) -> (i32, i32) {
    %c0_i32 = arith.constant 0 : i32
    %c0_i32_0 = arith.constant 0 : i32
    %c0_i32_1 = arith.constant 0 : i32
    return %c0_i32, %c0_i32_0 : i32, i32
  }
  func.func @transform_4(%arg0: i32) -> (i32, i32) {
    %c0_i32 = arith.constant 0 : i32
    %c0_i32_0 = arith.constant 0 : i32
    %c0_i32_1 = arith.constant 0 : i32
    return %c0_i32, %c0_i32_0 : i32, i32
  }
  func.func @transform_5(%arg0: i32) -> (i32, i32) {
    %c0_i32 = arith.constant 0 : i32
    %c0_i32_0 = arith.constant 0 : i32
    %c0_i32_1 = arith.constant 0 : i32
    return %c0_i32, %c0_i32_0 : i32, i32
  }
  func.func @transform_6(%arg0: i32) -> (i32, i32) {
    %c0_i32 = arith.constant 0 : i32
    %c0_i32_0 = arith.constant 0 : i32
    %c0_i32_1 = arith.constant 0 : i32
    return %c0_i32, %c0_i32_0 : i32, i32
  }
  func.func @transform_7(%arg0: i32) -> (i32, i32) {
    %c0_i32 = arith.constant 0 : i32
    %c0_i32_0 = arith.constant 0 : i32
    %c0_i32_1 = arith.constant 0 : i32
    return %c0_i32, %c0_i32_0 : i32, i32
  }
  func.func @transform_8(%arg0: i32) -> (i32, i32) {
    %c0_i32 = arith.constant 0 : i32
    %c0_i32_0 = arith.constant 0 : i32
    %c0_i32_1 = arith.constant 0 : i32
    return %c0_i32, %c0_i32_0 : i32, i32
  }
  func.func @transform_9(%arg0: i32) -> (i32, i32) {
    %c0_i32 = arith.constant 0 : i32
    %c0_i32_0 = arith.constant 0 : i32
    %c0_i32_1 = arith.constant 0 : i32
    return %c0_i32, %c0_i32_0 : i32, i32
  }
  func.func @transform_10(%arg0: i32) -> (i32, i32) {
    %c0_i32 = arith.constant 0 : i32
    %c0_i32_0 = arith.constant 0 : i32
    %c0_i32_1 = arith.constant 0 : i32
    return %c0_i32, %c0_i32_0 : i32, i32
  }
  func.func @transform_11(%arg0: i32) -> (i32, i32) {
    %c0_i32 = arith.constant 0 : i32
    %c0_i32_0 = arith.constant 0 : i32
    %c0_i32_1 = arith.constant 0 : i32
    return %c0_i32, %c0_i32_0 : i32, i32
  }
  func.func @transform_12(%arg0: i32) -> (i32, i32) {
    %c0_i32 = arith.constant 0 : i32
    %c0_i32_0 = arith.constant 0 : i32
    %c0_i32_1 = arith.constant 0 : i32
    return %c0_i32, %c0_i32_0 : i32, i32
  }
  func.func @transform_13(%arg0: i32) -> (i32, i32, i32) {
    %c0_i32 = arith.constant 0 : i32
    %c0_i32_0 = arith.constant 0 : i32
    %c0_i32_1 = arith.constant 0 : i32
    return %arg0, %c0_i32, %c0_i32_0 : i32, i32, i32
  }
}

</mosaic_0001>

<bundles_post_ra>
// kernel: tpu_custom_call.1
= control target key start
LH: loop header
LB: loop body
LE: loop exit
PB: predicated region body
PF: predicated region fallthrough
CT: control target
= control target key end

     0   :  { %s2331_s0 = inlined_call_operand.vmem [shape: f32[2,8,32], index: 0, kind: input, shape index: {}]   ;;  %s2332_s1 = inlined_call_operand.vmem [shape: f32[1,32], index: 1, kind: input, shape index: {}]   ;;  %s2333_s2 = inlined_call_operand.vmem [shape: f32[1,32], index: 2, kind: input, shape index: {}]   ;;  %s2334_s3 = inlined_call_operand.vmem [shape: f32[32,96], index: 3, kind: input, shape index: {}]   ;;  %s2335_s4 = inlined_call_operand.vmem [shape: f32[1,96], index: 4, kind: input, shape index: {}]   ;;  %s2336_s5 = inlined_call_operand.vmem [shape: f32[32,32], index: 5, kind: input, shape index: {}]   ;;  %s2337_s6 = inlined_call_operand.vmem [shape: f32[1,32], index: 6, kind: input, shape index: {}]   ;;  %s2338_s7 = inlined_call_operand.vmem [shape: f32[1,32], index: 7, kind: input, shape index: {}]   ;;  %s2339_s8 = inlined_call_operand.vmem [shape: f32[1,32], index: 8, kind: input, shape index: {}]   ;;  %s2340_s9 = inlined_call_operand.vmem [shape: f32[32,128], index: 9, kind: input, shape index: {}]   ;;  %s2341_s10 = inlined_call_operand.vmem [shape: f32[1,128], index: 10, kind: input, shape index: {}]   ;;  %s2342_s11 = inlined_call_operand.vmem [shape: f32[128,32], index: 11, kind: input, shape index: {}]   ;;  %s2343_s12 = inlined_call_operand.vmem [shape: f32[1,32], index: 12, kind: input, shape index: {}]   ;;  %s2344_s13 = inlined_call_operand.hbm [shape: f32[2,8,32], index: 13, kind: output, shape index: {}]  }
   0x1   :  { %2345 = sst [smem:[#allocation6_spill]] %s2331_s0 }
   0x2   :  { %2346 = sst [smem:[#allocation7_spill]] %s2332_s1 }
   0x3   :  { %2347 = sst [smem:[#allocation8_spill]] %s2333_s2 }
   0x4   :  { %2348 = sst [smem:[#allocation9_spill]] %s2334_s3 }
   0x5   :  { %18 = vsyncpa [#allocation4], 0 }
   0x6   :  { %20 = vsyncpa [#allocation4 + $0x1], 0  ;;  %s2026_s25 = smov 0   ;;  %s2028_s26 = smov 0  }
   0x7   :  { %s2030_s27 = smov 0   ;;  %s2032_s28 = smov 0  }
   0x8 LB: > { %s2047_s29 = sadd.s32 4294967295, %s1937_s28   ;;  %s1608_s30 = sadd.s32 4294967294, %s1937_s28   ;;  %s1937_s28 = sphi %s2032_s28, %s2358_s28   ;;  %s1933_s27 = sphi %s2030_s27, %s2357_s27   ;;  %s1929_s26 = sphi %s2028_s26, %s2356_s26   ;;  %s1925_s25 = sphi %s2026_s25, %s2355_s25  }
   0x9   : > { %s2051_s14 = sadd.s32 1, %s1937_s28   ;;  %s311_s15 = sadd.s32 1, %s1933_s27 }
   0xa   : > { %s308_s16 = ssub.s32 %s1937_s28, %s2051_s14  ;;  %p321_p0 = scmp.ne.s32.totalorder %s1933_s27, %s1929_s26 }
   0xb   : > { %p309_p1 = scmp.eq.s32.totalorder %s308_s16, 0  ;;  %p322_p2 = scmp.eq.s32.totalorder %s2047_s29, 1 }
   0xc   : > { %p327_p3 = scmp.ne.s32.totalorder %s1929_s26, %s1925_s25  ;;  %p328_p4 = scmp.eq.s32.totalorder %s1608_s30, 1 }
   0xd   : > { %s2062_s17 = scalar_select %p309_p1, %s1933_s27, %s311_s15  }
   0xe   : > { %p2064_p5 = por %p322_p2, %p321_p0  ;;  %p2068_p6 = por %p328_p4, %p327_p3 }
   0xf   : > { %p1611_p7 = scmp.ge.s32.totalorder %s1937_s28, 1  ;;  %p389_p8 = scmp.lt.s32.totalorder %s1937_s28, 3 }
  0x11   : > { %p390_p9 = pnand %p1611_p7, %p389_p8 }
  0x12   : > { %p432_p10 = scmp.lt.s32.totalorder (!%p390_p9), %s2047_s29, 1  ;;  %s2351_s0 = sld [smem:[#allocation6_spill]] (!%p390_p9) }
  0x13   : > { %393 = sbr.rel (%p390_p9) target bundleno = 2434 (0x982), region = 72  ;;  %s2352_s3 = sld [smem:[#allocation9_spill]] (!%p390_p9) }
  0x14   : > { %s2353_s1 = sld [smem:[#allocation7_spill]] (!%p390_p9)  ;;  %s1941_s23 = smov (!%p390_p9), 96  }
  0x15   : > { %s2354_s2 = sld [smem:[#allocation8_spill]] (!%p390_p9)  ;;  %s1943_s30 = smov (!%p390_p9), 88  }
  0x16   : > { %s1944_s15 = smov (!%p390_p9), 80   ;;  %s1945_s16 = smov (!%p390_p9), 72  }
  0x17   : > { %s1948_s22 = smov (!%p390_p9), 64  }
  0x18   : > { %s433_s20 = scalar_select %p432_p10, %s2047_s29, 1  ;;  %vm439_vm0 = vcmask 261120   ;;  %v1939_v8 = vmov 0.0   ;;  %vm1940_vm1 = vmmov 0   ;;  %v1616_v21 = vld [vmem:[%s2335_s4] ss:$0 sm:$0xff] }
  0x19   : > { %v471_v7 = vld [vmem:[%s2352_s3 + $0x18] sm:$0xff]  ;;  %1690 = vmatprep.subr.mxu1 %v1939_v8  ;;  %v470_v9 = vld [vmem:[%s2352_s3 + $0x10] sm:$0xff]  ;;  %1698 = vmatprep.mubr.msk.f32.mxu1 %vm1940_vm1, %v1939_v8  ;;  %v469_v10 = vld [vmem:[%s2352_s3 + $0x8] sm:$0xff]  ;;  %vm556_vm2 = vcmask 64512   ;;  %vm889_vm3 = vcmask 130112   ;;  %vm1060_vm4 = vcmask 195712  }
  0x1a   : > { %s1613_s21 = sshll.u32 %s433_s20, 3  ;;  %1691 = vmatpush3.msra.mxu1 %v471_v7  ;;  %1711 = vmatprep.subr.mxu0 %v1939_v8  ;;  %v468_v11 = vld [vmem:[%s2352_s3] sm:$0xff]  ;;  %s1946_s20 = smov 112   ;;  %vm1231_vm5 = vcmask 261312  }
  0x1b   : > { %s435_s24 = scalar_lea.vmem %s2351_s0, %s1613_s21  ;;  %1692 = vmatprep.subr.mxu1 %v1939_v8  ;;  %1713 = vmatprep.mubr.msk.f32.mxu0 %vm1940_vm1, %v1939_v8  ;;  %v1614_v16 = vld [vmem:[%s2353_s1] ss:$0 sm:$0xff]  ;;  %s1947_s21 = smov 104  }
  0x1c   : > { %v2079_v0 = vld [vmem:[%s435_s24] sm:$0xff]  ;;  %1693 = vmatpush3.msra.mxu1 %v470_v9  ;;  %s1942_s24 = smov 120  }
  0x1d   : > { %v440_v1 = vsel %vm439_vm0, %v2079_v0, 0.0  ;;  %1694 = vmatprep.subr.mxu1 %v1939_v8  ;;  %v1615_v18 = vld [vmem:[%s2354_s2] ss:$0 sm:$0xff] }
  0x1e   : > { %441 = vadd.xlane.f32.xlu0 %v440_v1  ;;  %1695 = vmatpush3.msra.mxu1 %v469_v10 }
  0x1f   : > { %1696 = vmatprep.subr.mxu1 %v1939_v8 }
  0x20   : > { %1697 = vmatpush3.msra.mxu1 %v468_v11 }
  0x21   : > { %1701 = vmatprep.subr.mxu1 %v1939_v8 }
  0xa7   : > { %v442_v2 = vpop.xlane.xlu0 %441 }
  0xa8   : > { %v444_v3 = vmul.f32 0.03125, %v442_v2 }
  0xaa   : > { %v445_v4 = vsub.f32 %v2079_v0, %v444_v3 }
  0xac   : > { %v446_v5 = vmul.f32 %v445_v4, %v445_v4 }
  0xae   : > { %v447_v6 = vsel %vm439_vm0, %v446_v5, 0.0 }
  0xaf   : > { %448 = vadd.xlane.f32.xlu0 %v447_v6 }
 0x138   : > { %v449_v12 = vpop.xlane.xlu0 %448 }
 0x139   : > { %v450_v13 = vmul.f32 0.03125, %v449_v12 }
 0x13b   : > { %v451_v14 = vadd.f32 1e-05, %v450_v13 }
 0x13d   : > { %1853 = vrsqrt.f32 %v451_v14 }
 0x14a   : > { %v1854_v15 = vpop.eup %1853 }
 0x14b   : > { %v453_v17 = vmul.f32 %v1854_v15, %v445_v4 }
 0x14d   : > { %v460_v19 = vmul.f32 %v1614_v16, %v453_v17 }
 0x14f   : > { %v467_v20 = vadd.f32 %v1615_v18, %v460_v19 }
 0x151   : > { %1699 = vmatmul.mubr.msk.f32.vlgmr.msra.gmra.mxu1 %vm439_vm0, %v467_v20 }
 0x152   : > { %1703 = vmatprep.mubr.msk.f32.mxu1 %vm1940_vm1, %v1939_v8 }
 0x211   : > { %v548_v22 = vpop.f32.mrf.mxu1 }
 0x212   : > { %v2119_v23 = vadd.f32 %v1616_v21, %v548_v22  ;;  %v1237_v21 = vld [vmem:[%s2336_s5 + $0x18] sm:$0xff]  ;;  %v1236_v22 = vld [vmem:[%s2336_s5 + $0x10] sm:$0xff] }
 0x213   : > { %v1700_v24 = vpop.f32.mrf.mxu1 }
 0x214   : > { %554 = vrot.lane.b32.xlu1 %v2119_v23, %s1941_s23  ;;  %v552_v25 = vmul.f32 0.35355338, %v2119_v23  ;;  %s1949_s23 = smov 48   ;;  %v1235_v24 = vld [vmem:[%s2336_s5 + $0x8] sm:$0xff] }
 0x216   : > { %720 = vrot.lane.b32.xlu0 %v552_v25, %s1942_s24  ;;  %s1950_s24 = smov 40  }
 0x218   : > { %722 = vrot.lane.b32.xlu1 %v2119_v23, %s1943_s30  ;;  %s1951_s30 = smov 56  }
 0x21c   : > { %893 = vrot.lane.b32.xlu1 %v2119_v23, %s1944_s15 }
 0x220   : > { %1064 = vrot.lane.b32.xlu1 %v2119_v23, %s1945_s16  ;;  %s1953_s16 = smov 16  }
 0x224   : > { %891 = vrot.lane.b32.xlu1 %v552_v25, %s1946_s20  ;;  %s1954_s20 = smov 24  }
 0x228   : > { %1062 = vrot.lane.b32.xlu1 %v552_v25, %s1947_s21  ;;  %s429_s21 = sand.u32 1, %s1929_s26  }
 0x229   : > { %s1536_s2 = scalar_lea.sflag [#allocation4], %s429_s21 }
 0x286   : > { %v555_v26 = vpop.permute.xlu1 %554 }
 0x287   : > { %1702 = vmatpush3.xpose.msk.msra.mxu1 %vm556_vm2, %v555_v26  ;;  %v1234_v26 = vld [vmem:[%s2336_s5] sm:$0xff] }
 0x288   : > { %1706 = vmatprep.subr.mxu1 %v1939_v8  ;;  %v721_v28 = vpop.permute.xlu0 %720 }
 0x28a   : > { %v723_v27 = vpop.permute.xlu1 %722  ;;  %1704 = vmatmul.mubr.msk.f32.vlgmr.msra.gmra.mxu1 %vm556_vm2, %v552_v25 }
 0x28b   : > { %1712 = vmatpush3.xpose.msk.msra.mxu0 %vm556_vm2, %v723_v27  ;;  %1708 = vmatprep.mubr.msk.f32.mxu1 %vm1940_vm1, %v1939_v8 }
 0x28c   : > { %1721 = vmatprep.subr.mxu0 %v1939_v8 }
 0x28e   : > { %v894_v29 = vpop.permute.xlu1 %893  ;;  %1714 = vmatmul.mubr.msk.f32.vlgmr.msra.gmra.mxu0 %vm556_vm2, %v721_v28 }
 0x28f   : > { %1722 = vmatpush3.xpose.msk.msra.mxu0 %vm556_vm2, %v894_v29  ;;  %1723 = vmatprep.mubr.msk.f32.mxu0 %vm1940_vm1, %v1939_v8 }
 0x290   : > { %1731 = vmatprep.subr.mxu0 %v1939_v8 }
 0x292   : > { %v1065_v30 = vpop.permute.xlu1 %1064 }
 0x296   : > { %v892_v31 = vpop.permute.xlu1 %891 }
 0x297   : > { %1724 = vmatmul.mubr.msk.f32.vlgmr.msra.gmra.mxu0 %vm556_vm2, %v892_v31 }
 0x298   : > { %1732 = vmatpush3.xpose.msk.msra.mxu0 %vm556_vm2, %v1065_v30  ;;  %1733 = vmatprep.mubr.msk.f32.mxu0 %vm1940_vm1, %v1939_v8 }
 0x299   : > { %1763 = vmatprep.subr.mxu0 %v1939_v8 }
 0x29a   : > { %v1063_v32 = vpop.permute.xlu1 %1062 }
 0x29b   : > { %1734 = vmatmul.mubr.msk.f32.vlgmr.msra.gmra.mxu0 %vm556_vm2, %v1063_v32 }
 0x29c   : > { %1795 = vmatprep.mubr.msk.f32.mxu0 %vm1940_vm1, %v1939_v8 }
 0x34a   : > { %v628_v33 = vpop.f32.mrf.mxu1 }
 0x34b   : > { %v632_v34 = vsel %vm556_vm2, %v628_v33, -inf }
 0x34c   : > { %633 = vmax.xlane.f32.xlu1 %v632_v34  ;;  %v1705_v35 = vpop.f32.mrf.mxu1 }
 0x34d   : > { %v1630_v35 = vld [vmem:[%s2337_s6] ss:$0 sm:$0xff] }
 0x34e   : > { %v794_v36 = vpop.f32.mrf.mxu0 }
 0x34f   : > { %v798_v37 = vsel %vm556_vm2, %v794_v36, -inf }
 0x350   : > { %799 = vmax.xlane.f32.xlu0 %v798_v37  ;;  %v1715_v38 = vpop.f32.mrf.mxu0 }
 0x357   : > { %v965_v39 = vpop.f32.mrf.mxu0 }
 0x358   : > { %v969_v40 = vsel %vm556_vm2, %v965_v39, -inf }
 0x359   : > { %v1725_v41 = vpop.f32.mrf.mxu0  ;;  %970 = vmax.xlane.f32.xlu1 %v969_v40 }
 0x35b   : > { %v1136_v42 = vpop.f32.mrf.mxu0 }
 0x35c   : > { %v1140_v43 = vsel %vm556_vm2, %v1136_v42, -inf }
 0x35d   : > { %1141 = vmax.xlane.f32.xlu0 %v1140_v43  ;;  %v1735_v44 = vpop.f32.mrf.mxu0 }
 0x36a   : > { %643 = vrot.lane.b32.xlu1 %v2119_v23, %s1948_s22  ;;  %s1952_s22 = smov 8  }
 0x3d5   : > { %v634_v45 = vpop.xlane.xlu1 %633 }
 0x3d6   : > { %v635_v46 = vsub.f32 %v628_v33, %v634_v45 }
 0x3d8   : > { %v636_v47 = vmul.f32 1.442695, %v635_v46  ;;  %v1351_v46 = vld [vmem:[%s2340_s9 + $0x18] sm:$0xff] }
 0x3d9   : > { %v800_v48 = vpop.xlane.xlu0 %799 }
 0x3da   : > { %1855 = vpow2.f32 %v636_v47  ;;  %v801_v49 = vsub.f32 %v794_v36, %v800_v48  ;;  %v1349_v47 = vld [vmem:[%s2340_s9 + $0x8] sm:$0xff]  ;;  %v1348_v48 = vld [vmem:[%s2340_s9] sm:$0xff] }
 0x3dc   : > { %v802_v50 = vmul.f32 1.442695, %v801_v49 }
 0x3de   : > { %1857 = vpow2.f32 %v802_v50 }
 0x3e2   : > { %v971_v51 = vpop.xlane.xlu1 %970 }
 0x3e3   : > { %v972_v52 = vsub.f32 %v965_v39, %v971_v51 }
 0x3e5   : > { %v973_v53 = vmul.f32 1.442695, %v972_v52 }
 0x3e6   : > { %v1142_v54 = vpop.xlane.xlu0 %1141  ;;  %v644_v55 = vpop.permute.xlu1 %643 }
 0x3e7   : > { %v1856_v56 = vpop.eup %1855  ;;  %1859 = vpow2.f32 %v973_v53  ;;  %v1143_v57 = vsub.f32 %v1136_v42, %v1142_v54  ;;  %1707 = vmatpush3.msra.mxu1 %v644_v55  ;;  %v1632_v53 = vld [vmem:[%s2338_s7] ss:$0 sm:$0xff] }
 0x3e8   : > { %v638_v58 = vsel %vm556_vm2, %v1856_v56, 0.0  ;;  %1716 = vmatprep.subr.mxu1 %v1939_v8  ;;  %v1633_v55 = vld [vmem:[%s2339_s8] ss:$0 sm:$0xff] }
 0x3e9   : > { %v1144_v59 = vmul.f32 1.442695, %v1143_v57  ;;  %639 = vadd.xlane.f32.xlu1 %v638_v58  ;;  %v1455_v58 = vld [vmem:[%s2342_s11 + $0x78] sm:$0xff] }
 0x3ea   : > { %1764 = vmatpush3.msra.mxu0 %v1455_v58 }
 0x3eb   : > { %v1858_v60 = vpop.eup %1857  ;;  %1861 = vpow2.f32 %v1144_v59  ;;  %1765 = vmatprep.subr.mxu0 %v1939_v8  ;;  %v1454_v59 = vld [vmem:[%s2342_s11 + $0x70] sm:$0xff] }
 0x3ec   : > { %v804_v61 = vsel %vm556_vm2, %v1858_v60, 0.0  ;;  %1766 = vmatpush3.msra.mxu0 %v1454_v59 }
 0x3ed   : > { %805 = vadd.xlane.f32.xlu0 %v804_v61  ;;  %1767 = vmatprep.subr.mxu0 %v1939_v8  ;;  %v1452_v61 = vld [vmem:[%s2342_s11 + $0x60] sm:$0xff] }
 0x3f4   : > { %v1860_v62 = vpop.eup %1859 }
 0x3f5   : > { %v975_v63 = vsel %vm556_vm2, %v1860_v62, 0.0 }
 0x3f6   : > { %976 = vadd.xlane.f32.xlu1 %v975_v63  ;;  %v1450_v63 = vld [vmem:[%s2342_s11 + $0x50] sm:$0xff] }
 0x3f8   : > { %v1862_v1 = vpop.eup %1861 }
 0x3f9   : > { %v1146_v2 = vsel %vm556_vm2, %v1862_v1, 0.0 }
 0x3fa   : > { %1147 = vadd.xlane.f32.xlu0 %v1146_v2  ;;  %v1448_v2 = vld [vmem:[%s2342_s11 + $0x40] sm:$0xff] }
 0x407   : > { %980 = vrot.lane.b32.xlu1 %v2119_v23, %s1949_s23 }
 0x40b   : > { %1151 = vrot.lane.b32.xlu1 %v2119_v23, %s1950_s24 }
 0x410   : > { %809 = vrot.lane.b32.xlu0 %v2119_v23, %s1951_s30  ;;  %s1639_s30 = sshll.u32 %s2047_s29, 7  ;;  %s1955_s29 = smov [#allocation3]  }
 0x411   : > { %s1547_s1 = scalar_lea.hbm %s2344_s13, %s1639_s30 }
 0x472   : > { %v640_v3 = vpop.xlane.xlu1 %639 }
 0x473   : > { %1863 = vrcp.f32 %v640_v3  ;;  %v1447_v3 = vld [vmem:[%s2342_s11 + $0x38] sm:$0xff] }
 0x476   : > { %v806_v4 = vpop.xlane.xlu0 %805 }
 0x477   : > { %1865 = vrcp.f32 %v806_v4  ;;  %v1446_v4 = vld [vmem:[%s2342_s11 + $0x30] sm:$0xff] }
 0x47f   : > { %v977_v5 = vpop.xlane.xlu1 %976 }
 0x480   : > { %v1864_v6 = vpop.eup %1863  ;;  %1867 = vrcp.f32 %v977_v5  ;;  %v1445_v5 = vld [vmem:[%s2342_s11 + $0x28] sm:$0xff] }
 0x481   : > { %v642_v7 = vmul.f32 %v1864_v6, %v1856_v56  ;;  %v1444_v6 = vld [vmem:[%s2342_s11 + $0x20] sm:$0xff] }
 0x483   : > { %v1148_v9 = vpop.xlane.xlu0 %1147  ;;  %1709 = vmatmul.mubr.msk.f32.vlgmr.msra.gmra.mxu1 %vm556_vm2, %v642_v7  ;;  %v981_v13 = vpop.permute.xlu1 %980  ;;  %v1443_v7 = vld [vmem:[%s2342_s11 + $0x18] sm:$0xff] }
 0x484   : > { %v1866_v10 = vpop.eup %1865  ;;  %1869 = vrcp.f32 %v1148_v9  ;;  %1718 = vmatprep.mubr.msk.f32.mxu1 %vm1940_vm1, %v1939_v8  ;;  %v1442_v9 = vld [vmem:[%s2342_s11 + $0x10] sm:$0xff] }
 0x485   : > { %v808_v12 = vmul.f32 %v1866_v10, %v1858_v60  ;;  %v1453_v60 = vld [vmem:[%s2342_s11 + $0x68] sm:$0xff] }
 0x486   : > { %1768 = vmatpush3.msra.mxu0 %v1453_v60  ;;  %v1441_v10 = vld [vmem:[%s2342_s11 + $0x8] sm:$0xff] }
 0x487   : > { %v810_v11 = vpop.permute.xlu0 %809  ;;  %v1152_v16 = vpop.permute.xlu1 %1151  ;;  %1769 = vmatprep.subr.mxu0 %v1939_v8 }
 0x488   : > { %1717 = vmatpush3.msra.mxu1 %v810_v11  ;;  %1770 = vmatpush3.msra.mxu0 %v1452_v61  ;;  %v1440_v11 = vld [vmem:[%s2342_s11] sm:$0xff] }
 0x489   : > { %1719 = vmatmul.mubr.msk.f32.vlgmr.msra.gmra.mxu1 %vm556_vm2, %v808_v12  ;;  %1726 = vmatprep.subr.mxu1 %v1939_v8  ;;  %v1634_v12 = vld [vmem:[%s2341_s10] ss:$0 sm:$0xff] }
 0x48a   : > { %1727 = vmatpush3.msra.mxu1 %v981_v13  ;;  %1728 = vmatprep.mubr.msk.f32.mxu1 %vm1940_vm1, %v1939_v8 }
 0x48b   : > { %1736 = vmatprep.subr.mxu1 %v1939_v8  ;;  %1771 = vmatprep.subr.mxu0 %v1939_v8 }
 0x48d   : > { %v1868_v14 = vpop.eup %1867 }
 0x48e   : > { %v979_v15 = vmul.f32 %v1868_v14, %v1860_v62  ;;  %v1451_v62 = vld [vmem:[%s2342_s11 + $0x58] sm:$0xff] }
 0x48f   : > { %1772 = vmatpush3.msra.mxu0 %v1451_v62 }
 0x490   : > { %1729 = vmatmul.mubr.msk.f32.vlgmr.msra.gmra.mxu1 %vm556_vm2, %v979_v15  ;;  %1773 = vmatprep.subr.mxu0 %v1939_v8 }
 0x491   : > { %v1870_v17 = vpop.eup %1869  ;;  %1737 = vmatpush3.msra.mxu1 %v1152_v16  ;;  %1738 = vmatprep.mubr.msk.f32.mxu1 %vm1940_vm1, %v1939_v8 }
 0x492   : > { %v1150_v18 = vmul.f32 %v1870_v17, %v1862_v1  ;;  %1741 = vmatprep.subr.mxu1 %v1939_v8  ;;  %1774 = vmatpush3.msra.mxu0 %v1450_v63  ;;  %v1449_v1 = vld [vmem:[%s2342_s11 + $0x48] sm:$0xff] }
 0x493   : > { %1775 = vmatprep.subr.mxu0 %v1939_v8 }
 0x494   : > { %1739 = vmatmul.mubr.msk.f32.vlgmr.msra.gmra.mxu1 %vm556_vm2, %v1150_v18  ;;  %1776 = vmatpush3.msra.mxu0 %v1449_v1 }
 0x495   : > { %1749 = vmatprep.mubr.msk.f32.mxu1 %vm1940_vm1, %v1939_v8  ;;  %1742 = vmatpush3.msra.mxu1 %v1237_v21 }
 0x496   : > { %1743 = vmatprep.subr.mxu1 %v1939_v8  ;;  %1777 = vmatprep.subr.mxu0 %v1939_v8 }
 0x497   : > { %1744 = vmatpush3.msra.mxu1 %v1236_v22  ;;  %1778 = vmatpush3.msra.mxu0 %v1448_v2 }
 0x498   : > { %1745 = vmatprep.subr.mxu1 %v1939_v8  ;;  %1779 = vmatprep.subr.mxu0 %v1939_v8 }
 0x499   : > { %1746 = vmatpush3.msra.mxu1 %v1235_v24  ;;  %1780 = vmatpush3.msra.mxu0 %v1447_v3 }
 0x49a   : > { %1747 = vmatprep.subr.mxu1 %v1939_v8  ;;  %1781 = vmatprep.subr.mxu0 %v1939_v8 }
 0x49b   : > { %1748 = vmatpush3.msra.mxu1 %v1234_v26  ;;  %1782 = vmatpush3.msra.mxu0 %v1446_v4 }
 0x49c   : > { %1752 = vmatprep.subr.mxu1 %v1939_v8  ;;  %1783 = vmatprep.subr.mxu0 %v1939_v8 }
 0x49d   : > { %1784 = vmatpush3.msra.mxu0 %v1445_v5 }
 0x49e   : > { %1785 = vmatprep.subr.mxu0 %v1939_v8 }
 0x49f   : > { %1786 = vmatpush3.msra.mxu0 %v1444_v6 }
 0x4a0   : > { %1787 = vmatprep.subr.mxu0 %v1939_v8 }
 0x4a1   : > { %1788 = vmatpush3.msra.mxu0 %v1443_v7 }
 0x4a2   : > { %1789 = vmatprep.subr.mxu0 %v1939_v8 }
 0x4a3   : > { %1790 = vmatpush3.msra.mxu0 %v1442_v9 }
 0x4a4   : > { %1791 = vmatprep.subr.mxu0 %v1939_v8 }
 0x4a5   : > { %1792 = vmatpush3.msra.mxu0 %v1441_v10 }
 0x4a6   : > { %1793 = vmatprep.subr.mxu0 %v1939_v8 }
 0x4a7   : > { %1794 = vmatpush3.msra.mxu0 %v1440_v11 }
 0x543   : > { %v715_v19 = vpop.f32.mrf.mxu1 }
 0x544   : > { %719 = vst.msk [vmem:[#allocation2] sm:$0xff] %vm556_vm2, %v715_v19 }
 0x545   : > { %v1710_v20 = vpop.f32.mrf.mxu1 }
 0x549   : > { %v881_v23 = vpop.f32.mrf.mxu1 }
 0x54a   : > { %886 = vrot.lane.b32.xlu0 %v881_v23, %s1952_s22  ;;  %s1612_s22 = sshll.u32 %s429_s21, 3 }
 0x54b   : > { %v1720_v25 = vpop.f32.mrf.mxu1  ;;  %s431_s15 = scalar_lea.vmem [#allocation3], %s1612_s22  ;;  %s1881_s22 = sshll.u32 %s1955_s29, 4  ;;  %s1882_s22 = int_to_ptr.vmem [resolvable:$false] %s1881_s22 }
 0x54c   : > { %s1883_s23 = scalar_lea.vmem %s1882_s22, 256 }
 0x550   : > { %v1052_v27 = vpop.f32.mrf.mxu1 }
 0x551   : > { %1057 = vrot.lane.b32.xlu1 %v1052_v27, %s1953_s16  ;;  %s1549_s16 = sshll.u32 %s431_s15, 4  ;;  %s1550_s16 = int_to_ptr.vmem [resolvable:$true] %s1549_s16 }
 0x552   : > { %v1730_v28 = vpop.f32.mrf.mxu1  ;;  %s1877_s3 = scalar_lea.vmem %s1550_s16, 128  ;;  %p1884_p0 = scmp.lt.s32.totalorder %s1550_s16, %s1882_s22 }
 0x553   : > { %p1878_p11 = scmp.ne.s32.totalorder %s1550_s16, %s1877_s3  ;;  %p1885_p1 = scmp.lt.s32.totalorder %s1883_s23, %s1877_s3 }
 0x554   : > { %v1223_v29 = vpop.f32.mrf.mxu1 }
 0x555   : > { %1228 = vrot.lane.b32.xlu0 %v1223_v29, %s1954_s20  ;;  %p1879_p12 = pnand %p1878_p11, %p2064_p5  ;;  %p1886_p2 = por %p1885_p1, %p1884_p0 }
 0x556   : > { %v1740_v30 = vpop.f32.mrf.mxu1 }
 0x557   : > { %p1880_p13 = pneg %p1879_p12 }
 0x559   : > { %p1887_p3 = pnand %p1886_p2, %p1880_p13 }
 0x5bc   : > { %v887_v31 = vpop.permute.xlu0 %886 }
 0x5bd   : > { %890 = vst.msk [vmem:[#allocation2] sm:$0xff] %vm889_vm3, %v887_v31 }
 0x5c3   : > { %v1058_v32 = vpop.permute.xlu1 %1057 }
 0x5c4   : > { %1061 = vst.msk [vmem:[#allocation2] sm:$0xff] %vm1060_vm4, %v1058_v32 }
 0x5c7   : > { %v1229_v33 = vpop.permute.xlu0 %1228 }
 0x5c8   : > { %1232 = vst.msk [vmem:[#allocation2] sm:$0xff] %vm1231_vm5, %v1229_v33 }
 0x5cf   : > { %v1233_v34 = vld [vmem:[#allocation2] sm:$0xff] }
 0x5d0   : > { %1750 = vmatmul.mubr.msk.f32.vlgmr.msra.gmra.mxu1 %vm439_vm0, %v1233_v34 }
 0x5d1   : > { %1760 = vmatprep.mubr.msk.f32.mxu1 %vm1940_vm1, %v1939_v8  ;;  %1753 = vmatpush3.msra.mxu1 %v1351_v46 }
 0x5d2   : > { %1754 = vmatprep.subr.mxu1 %v1939_v8 }
 0x690   : > { %v1314_v36 = vpop.f32.mrf.mxu1 }
 0x691   : > { %v1315_v37 = vadd.f32 %v1630_v35, %v1314_v36 }
 0x692   : > { %v1751_v38 = vpop.f32.mrf.mxu1 }
 0x693   : > { %v2198_v39 = vadd.f32 %v1315_v37, %v2079_v0  ;;  %v1350_v0 = vld [vmem:[%s2340_s9 + $0x10] sm:$0xff] }
 0x694   : > { %1755 = vmatpush3.msra.mxu1 %v1350_v0 }
 0x695   : > { %v1321_v40 = vsel %vm439_vm0, %v2198_v39, 0.0  ;;  %1756 = vmatprep.subr.mxu1 %v1939_v8 }
 0x696   : > { %1322 = vadd.xlane.f32.xlu1 %v1321_v40  ;;  %1757 = vmatpush3.msra.mxu1 %v1349_v47 }
 0x697   : > { %1758 = vmatprep.subr.mxu1 %v1939_v8  ;;  %v1637_v8 = vld [vmem:[%s2343_s12] ss:$0 sm:$0xff] }
 0x698   : > { %1759 = vmatpush3.msra.mxu1 %v1348_v48 }
 0x71f   : > { %v1323_v41 = vpop.xlane.xlu1 %1322 }
 0x720   : > { %v1324_v42 = vmul.f32 0.03125, %v1323_v41 }
 0x722   : > { %v1325_v43 = vsub.f32 %v2198_v39, %v1324_v42 }
 0x724   : > { %v1326_v44 = vmul.f32 %v1325_v43, %v1325_v43 }
 0x726   : > { %v1327_v45 = vsel %vm439_vm0, %v1326_v44, 0.0 }
 0x727   : > { %1328 = vadd.xlane.f32.xlu0 %v1327_v45 }
 0x7b0   : > { %v1329_v49 = vpop.xlane.xlu0 %1328 }
 0x7b1   : > { %v1330_v50 = vmul.f32 0.03125, %v1329_v49 }
 0x7b3   : > { %v1331_v51 = vadd.f32 1e-05, %v1330_v50 }
 0x7b5   : > { %1871 = vrsqrt.f32 %v1331_v51 }
 0x7c2   : > { %v1872_v52 = vpop.eup %1871 }
 0x7c3   : > { %v1333_v54 = vmul.f32 %v1872_v52, %v1325_v43 }
 0x7c5   : > { %v1340_v56 = vmul.f32 %v1632_v53, %v1333_v54 }
 0x7c7   : > { %v1347_v57 = vadd.f32 %v1633_v55, %v1340_v56 }
 0x7c9   : > { %1761 = vmatmul.mubr.msk.f32.vlgmr.msra.gmra.mxu1 %vm439_vm0, %v1347_v57 }
 0x889   : > { %v1428_v13 = vpop.f32.mrf.mxu1 }
 0x88a   : > { %v1429_v14 = vadd.f32 %v1634_v12, %v1428_v13 }
 0x88b   : > { %v1762_v15 = vpop.f32.mrf.mxu1 }
 0x88c   : > { %v1636_v16 = vmul.f32 -1.702, %v1429_v14 }
 0x88e   : > { %v1434_v17 = vmul.f32 1.442695, %v1636_v16 }
 0x890   : > { %1873 = vpow2.f32 %v1434_v17 }
 0x89d   : > { %v1874_v18 = vpop.eup %1873 }
 0x89e   : > { %v1436_v19 = vadd.f32 1.0, %v1874_v18 }
 0x8a0   : > { %1875 = vrcp.f32 %v1436_v19 }
 0x8ad   : > { %v1876_v20 = vpop.eup %1875 }
 0x8ae   : > { %v1439_v21 = vmul.f32 %v1876_v20, %v1429_v14 }
 0x8b0   : > { %1796 = vmatmul.mubr.f32.vlgmr.msra.gmra.mxu0 %v1439_v21 }
 0x970   : > { %v1529_v22 = vpop.f32.mrf.mxu0 }
 0x971   : > { %v1530_v23 = vadd.f32 %v1637_v8, %v1529_v22 }
 0x972   : > { %v1797_v24 = vpop.f32.mrf.mxu0 }
 0x973   : > { %v1533_v25 = vadd.f32 %v1530_v23, %v2198_v39 }
 0x975   : > { %1534 = vst.msk [vmem:[%s431_s15] sm:$0xff] %vm439_vm0, %v1533_v25 }
 0x976   : > { %1890 = shalt.err (!%p1887_p3)
}
 0x977   : > { %s1891_s0 = scalar_lea.hbm %s1547_s1, 128  ;;  %s1895_s30 = scalar_lea.hbm %s2344_s13, 256 }
 0x978   : > { %p1892_p4 = scmp.ne.s32.totalorder %s1547_s1, %s1891_s0  ;;  %p1896_p9 = scmp.lt.s32.totalorder %s1547_s1, %s2344_s13 }
 0x979   : > { %p1897_p10 = scmp.lt.s32.totalorder %s1895_s30, %s1891_s0 }
 0x97a   : > { %p1893_p7 = pnand %p1892_p4, %p2064_p5 }
 0x97b   : > { %p1898_p11 = por %p1897_p10, %p1896_p9 }
 0x97c   : > { %p1894_p8 = pneg %p1893_p7 }
 0x97e   : > { %p1899_p12 = pnand %p1898_p11, %p1894_p8 }
 0x980   : > { %1902 = shalt.err (!%p1899_p12)
}
 0x981   : > { %1798 = dma.vmem_to_hbm [thread:$0]  (%p2064_p5), %s1550_s16, 128, %s1547_s1, %s1536_s2  }
 0x982 PF: > { %p1804_p13 = scmp.ge.s32.totalorder %s1937_s28, 2  ;;  %s1561_s3 = sand.u32 1, %s1925_s25  }
 0x983   : > { %s1562_s29 = scalar_lea.sflag [#allocation4], %s1561_s3 }
 0x984   : > { %p1801_p0 = pnand %p1804_p13, %p2068_p6 }
 0x986   : > { %p1802_p1 = pneg %p1801_p0 }
 0x988   : > { %1920 = dma.done.wait (%p1802_p1), %s1562_s29, 128  }
 0x989   : > { %1922 = vsyncadd (%p1802_p1), %s1562_s29, 4294967168  ;;  %p23_p2 = scmp.ge.s32.totalorder %s2051_s14, 4   ;;  %s2355_s25 = smov %s1929_s26 }
 0x98a   : > { %s2356_s26 = smov %s1933_s27  ;;  %s2357_s27 = smov %s2062_s17 }
 0x98b   : > { %s2358_s28 = smov %s2051_s14  ;;  %25 = sbr.rel (!%p23_p2) target bundleno = 8 (0x8), region = 107 }
 0x990   :  { %1567 = vsyncpa [#allocation4], 1 }
 0x991   :  { %1569 = vsyncpa [#allocation4 + $0x1], 1 }

// kernel: tpu_custom_call.1
= control target key start
LH: loop header
LB: loop body
LE: loop exit
PB: predicated region body
PF: predicated region fallthrough
CT: control target
= control target key end

     0   :  { %s2331_s0 = inlined_call_operand.vmem [shape: f32[2,8,32], index: 0, kind: input, shape index: {}]   ;;  %s2332_s1 = inlined_call_operand.vmem [shape: f32[1,32], index: 1, kind: input, shape index: {}]   ;;  %s2333_s2 = inlined_call_operand.vmem [shape: f32[1,32], index: 2, kind: input, shape index: {}]   ;;  %s2334_s3 = inlined_call_operand.vmem [shape: f32[32,96], index: 3, kind: input, shape index: {}]   ;;  %s2335_s4 = inlined_call_operand.vmem [shape: f32[1,96], index: 4, kind: input, shape index: {}]   ;;  %s2336_s5 = inlined_call_operand.vmem [shape: f32[32,32], index: 5, kind: input, shape index: {}]   ;;  %s2337_s6 = inlined_call_operand.vmem [shape: f32[1,32], index: 6, kind: input, shape index: {}]   ;;  %s2338_s7 = inlined_call_operand.vmem [shape: f32[1,32], index: 7, kind: input, shape index: {}]   ;;  %s2339_s8 = inlined_call_operand.vmem [shape: f32[1,32], index: 8, kind: input, shape index: {}]   ;;  %s2340_s9 = inlined_call_operand.vmem [shape: f32[32,128], index: 9, kind: input, shape index: {}]   ;;  %s2341_s10 = inlined_call_operand.vmem [shape: f32[1,128], index: 10, kind: input, shape index: {}]   ;;  %s2342_s11 = inlined_call_operand.vmem [shape: f32[128,32], index: 11, kind: input, shape index: {}]   ;;  %s2343_s12 = inlined_call_operand.vmem [shape: f32[1,32], index: 12, kind: input, shape index: {}]   ;;  %s2344_s13 = inlined_call_operand.hbm [shape: f32[2,8,32], index: 13, kind: output, shape index: {}]  }
   0x1   :  { %2345 = sst [smem:[#allocation6_spill]] %s2331_s0 }
   0x2   :  { %2346 = sst [smem:[#allocation7_spill]] %s2332_s1 }
   0x3   :  { %2347 = sst [smem:[#allocation8_spill]] %s2333_s2 }
   0x4   :  { %2348 = sst [smem:[#allocation9_spill]] %s2334_s3 }
   0x5   :  { %18 = vsyncpa [#allocation4], 0 }
   0x6   :  { %20 = vsyncpa [#allocation4 + $0x1], 0  ;;  %s2026_s25 = smov 0   ;;  %s2028_s26 = smov 0  }
   0x7   :  { %s2030_s27 = smov 0   ;;  %s2032_s28 = smov 0  }
   0x8 LB: > { %s2047_s29 = sadd.s32 4294967295, %s1937_s28   ;;  %s1608_s30 = sadd.s32 4294967294, %s1937_s28   ;;  %s1937_s28 = sphi %s2032_s28, %s2358_s28   ;;  %s1933_s27 = sphi %s2030_s27, %s2357_s27   ;;  %s1929_s26 = sphi %s2028_s26, %s2356_s26   ;;  %s1925_s25 = sphi %s2026_s25, %s2355_s25  }
   0x9   : > { %s2051_s14 = sadd.s32 1, %s1937_s28   ;;  %s311_s15 = sadd.s32 1, %s1933_s27 }
   0xa   : > { %s308_s16 = ssub.s32 %s1937_s28, %s2051_s14  ;;  %p321_p0 = scmp.ne.s32.totalorder %s1933_s27, %s1929_s26 }
   0xb   : > { %p309_p1 = scmp.eq.s32.totalorder %s308_s16, 0  ;;  %p322_p2 = scmp.eq.s32.totalorder %s2047_s29, 1 }
   0xc   : > { %p327_p3 = scmp.ne.s32.totalorder %s1929_s26, %s1925_s25  ;;  %p328_p4 = scmp.eq.s32.totalorder %s1608_s30, 1 }
   0xd   : > { %s2062_s17 = scalar_select %p309_p1, %s1933_s27, %s311_s15  }
   0xe   : > { %p2064_p5 = por %p322_p2, %p321_p0  ;;  %p2068_p6 = por %p328_p4, %p327_p3 }
   0xf   : > { %p1611_p7 = scmp.ge.s32.totalorder %s1937_s28, 1  ;;  %p389_p8 = scmp.lt.s32.totalorder %s1937_s28, 3 }
  0x11   : > { %p390_p9 = pnand %p1611_p7, %p389_p8 }
  0x12   : > { %p432_p10 = scmp.lt.s32.totalorder (!%p390_p9), %s2047_s29, 1  ;;  %s2351_s0 = sld [smem:[#allocation6_spill]] (!%p390_p9) }
  0x13   : > { %393 = sbr.rel (%p390_p9) target bundleno = 2434 (0x982), region = 72  ;;  %s2352_s3 = sld [smem:[#allocation9_spill]] (!%p390_p9) }
  0x14   : > { %s2353_s1 = sld [smem:[#allocation7_spill]] (!%p390_p9)  ;;  %s1941_s23 = smov (!%p390_p9), 96  }
  0x15   : > { %s2354_s2 = sld [smem:[#allocation8_spill]] (!%p390_p9)  ;;  %s1943_s30 = smov (!%p390_p9), 88  }
  0x16   : > { %s1944_s15 = smov (!%p390_p9), 80   ;;  %s1945_s16 = smov (!%p390_p9), 72  }
  0x17   : > { %s1948_s22 = smov (!%p390_p9), 64  }
  0x18   : > { %s433_s20 = scalar_select %p432_p10, %s2047_s29, 1  ;;  %vm439_vm0 = vcmask 261120   ;;  %v1939_v8 = vmov 0.0   ;;  %vm1940_vm1 = vmmov 0   ;;  %v1616_v21 = vld [vmem:[%s2335_s4] ss:$0 sm:$0xff] }
  0x19   : > { %v471_v7 = vld [vmem:[%s2352_s3 + $0x18] sm:$0xff]  ;;  %1690 = vmatprep.subr.mxu1 %v1939_v8  ;;  %v470_v9 = vld [vmem:[%s2352_s3 + $0x10] sm:$0xff]  ;;  %1698 = vmatprep.mubr.msk.f32.mxu1 %vm1940_vm1, %v1939_v8  ;;  %v469_v10 = vld [vmem:[%s2352_s3 + $0x8] sm:$0xff]  ;;  %vm556_vm2 = vcmask 64512   ;;  %vm889_vm3 = vcmask 130112   ;;  %vm1060_vm4 = vcmask 195712  }
  0x1a   : > { %s1613_s21 = sshll.u32 %s433_s20, 3  ;;  %1691 = vmatpush3.msra.mxu1 %v471_v7  ;;  %1711 = vmatprep.subr.mxu0 %v1939_v8  ;;  %v468_v11 = vld [vmem:[%s2352_s3] sm:$0xff]  ;;  %s1946_s20 = smov 112   ;;  %vm1231_vm5 = vcmask 261312  }
  0x1b   : > { %s435_s24 = scalar_lea.vmem %s2351_s0, %s1613_s21  ;;  %1692 = vmatprep.subr.mxu1 %v1939_v8  ;;  %1713 = vmatprep.mubr.msk.f32.mxu0 %vm1940_vm1, %v1939_v8  ;;  %v1614_v16 = vld [vmem:[%s2353_s1] ss:$0 sm:$0xff]  ;;  %s1947_s21 = smov 104  }
  0x1c   : > { %v2079_v0 = vld [vmem:[%s435_s24] sm:$0xff]  ;;  %1693 = vmatpush3.msra.mxu1 %v470_v9  ;;  %s1942_s24 = smov 120  }
  0x1d   : > { %v440_v1 = vsel %vm439_vm0, %v2079_v0, 0.0  ;;  %1694 = vmatprep.subr.mxu1 %v1939_v8  ;;  %v1615_v18 = vld [vmem:[%s2354_s2] ss:$0 sm:$0xff] }
  0x1e   : > { %441 = vadd.xlane.f32.xlu0 %v440_v1  ;;  %1695 = vmatpush3.msra.mxu1 %v469_v10 }
  0x1f   : > { %1696 = vmatprep.subr.mxu1 %v1939_v8 }
  0x20   : > { %1697 = vmatpush3.msra.mxu1 %v468_v11 }
  0x21   : > { %1701 = vmatprep.subr.mxu1 %v1939_v8 }
  0xa7   : > { %v442_v2 = vpop.xlane.xlu0 %441 }
  0xa8   : > { %v444_v3 = vmul.f32 0.03125, %v442_v2 }
  0xaa   : > { %v445_v4 = vsub.f32 %v2079_v0, %v444_v3 }
  0xac   : > { %v446_v5 = vmul.f32 %v445_v4, %v445_v4 }
  0xae   : > { %v447_v6 = vsel %vm439_vm0, %v446_v5, 0.0 }
  0xaf   : > { %448 = vadd.xlane.f32.xlu0 %v447_v6 }
 0x138   : > { %v449_v12 = vpop.xlane.xlu0 %448 }
 0x139   : > { %v450_v13 = vmul.f32 0.03125, %v449_v12 }
 0x13b   : > { %v451_v14 = vadd.f32 1e-05, %v450_v13 }
 0x13d   : > { %1853 = vrsqrt.f32 %v451_v14 }
 0x14a   : > { %v1854_v15 = vpop.eup %1853 }
 0x14b   : > { %v453_v17 = vmul.f32 %v1854_v15, %v445_v4 }
 0x14d   : > { %v460_v19 = vmul.f32 %v1614_v16, %v453_v17 }
 0x14f   : > { %v467_v20 = vadd.f32 %v1615_v18, %v460_v19 }
 0x151   : > { %1699 = vmatmul.mubr.msk.f32.vlgmr.msra.gmra.mxu1 %vm439_vm0, %v467_v20 }
 0x152   : > { %1703 = vmatprep.mubr.msk.f32.mxu1 %vm1940_vm1, %v1939_v8 }
 0x211   : > { %v548_v22 = vpop.f32.mrf.mxu1 }
 0x212   : > { %v2119_v23 = vadd.f32 %v1616_v21, %v548_v22  ;;  %v1237_v21 = vld [vmem:[%s2336_s5 + $0x18] sm:$0xff]  ;;  %v1236_v22 = vld [vmem:[%s2336_s5 + $0x10] sm:$0xff] }
 0x213   : > { %v1700_v24 = vpop.f32.mrf.mxu1 }
 0x214   : > { %554 = vrot.lane.b32.xlu1 %v2119_v23, %s1941_s23  ;;  %v552_v25 = vmul.f32 0.35355338, %v2119_v23  ;;  %s1949_s23 = smov 48   ;;  %v1235_v24 = vld [vmem:[%s2336_s5 + $0x8] sm:$0xff] }
 0x216   : > { %720 = vrot.lane.b32.xlu0 %v552_v25, %s1942_s24  ;;  %s1950_s24 = smov 40  }
 0x218   : > { %722 = vrot.lane.b32.xlu1 %v2119_v23, %s1943_s30  ;;  %s1951_s30 = smov 56  }
 0x21c   : > { %893 = vrot.lane.b32.xlu1 %v2119_v23, %s1944_s15 }
 0x220   : > { %1064 = vrot.lane.b32.xlu1 %v2119_v23, %s1945_s16  ;;  %s1953_s16 = smov 16  }
 0x224   : > { %891 = vrot.lane.b32.xlu1 %v552_v25, %s1946_s20  ;;  %s1954_s20 = smov 24  }
 0x228   : > { %1062 = vrot.lane.b32.xlu1 %v552_v25, %s1947_s21  ;;  %s429_s21 = sand.u32 1, %s1929_s26  }
 0x229   : > { %s1536_s2 = scalar_lea.sflag [#allocation4], %s429_s21 }
 0x286   : > { %v555_v26 = vpop.permute.xlu1 %554 }
 0x287   : > { %1702 = vmatpush3.xpose.msk.msra.mxu1 %vm556_vm2, %v555_v26  ;;  %v1234_v26 = vld [vmem:[%s2336_s5] sm:$0xff] }
 0x288   : > { %1706 = vmatprep.subr.mxu1 %v1939_v8  ;;  %v721_v28 = vpop.permute.xlu0 %720 }
 0x28a   : > { %v723_v27 = vpop.permute.xlu1 %722  ;;  %1704 = vmatmul.mubr.msk.f32.vlgmr.msra.gmra.mxu1 %vm556_vm2, %v552_v25 }
 0x28b   : > { %1712 = vmatpush3.xpose.msk.msra.mxu0 %vm556_vm2, %v723_v27  ;;  %1708 = vmatprep.mubr.msk.f32.mxu1 %vm1940_vm1, %v1939_v8 }
 0x28c   : > { %1721 = vmatprep.subr.mxu0 %v1939_v8 }
 0x28e   : > { %v894_v29 = vpop.permute.xlu1 %893  ;;  %1714 = vmatmul.mubr.msk.f32.vlgmr.msra.gmra.mxu0 %vm556_vm2, %v721_v28 }
 0x28f   : > { %1722 = vmatpush3.xpose.msk.msra.mxu0 %vm556_vm2, %v894_v29  ;;  %1723 = vmatprep.mubr.msk.f32.mxu0 %vm1940_vm1, %v1939_v8 }
 0x290   : > { %1731 = vmatprep.subr.mxu0 %v1939_v8 }
 0x292   : > { %v1065_v30 = vpop.permute.xlu1 %1064 }
 0x296   : > { %v892_v31 = vpop.permute.xlu1 %891 }
 0x297   : > { %1724 = vmatmul.mubr.msk.f32.vlgmr.msra.gmra.mxu0 %vm556_vm2, %v892_v31 }
 0x298   : > { %1732 = vmatpush3.xpose.msk.msra.mxu0 %vm556_vm2, %v1065_v30  ;;  %1733 = vmatprep.mubr.msk.f32.mxu0 %vm1940_vm1, %v1939_v8 }
 0x299   : > { %1763 = vmatprep.subr.mxu0 %v1939_v8 }
 0x29a   : > { %v1063_v32 = vpop.permute.xlu1 %1062 }
 0x29b   : > { %1734 = vmatmul.mubr.msk.f32.vlgmr.msra.gmra.mxu0 %vm556_vm2, %v1063_v32 }
 0x29c   : > { %1795 = vmatprep.mubr.msk.f32.mxu0 %vm1940_vm1, %v1939_v8 }
 0x34a   : > { %v628_v33 = vpop.f32.mrf.mxu1 }
 0x34b   : > { %v632_v34 = vsel %vm556_vm2, %v628_v33, -inf }
 0x34c   : > { %633 = vmax.xlane.f32.xlu1 %v632_v34  ;;  %v1705_v35 = vpop.f32.mrf.mxu1 }
 0x34d   : > { %v1630_v35 = vld [vmem:[%s2337_s6] ss:$0 sm:$0xff] }
 0x34e   : > { %v794_v36 = vpop.f32.mrf.mxu0 }
 0x34f   : > { %v798_v37 = vsel %vm556_vm2, %v794_v36, -inf }
 0x350   : > { %799 = vmax.xlane.f32.xlu0 %v798_v37  ;;  %v1715_v38 = vpop.f32.mrf.mxu0 }
 0x357   : > { %v965_v39 = vpop.f32.mrf.mxu0 }
 0x358   : > { %v969_v40 = vsel %vm556_vm2, %v965_v39, -inf }
 0x359   : > { %v1725_v41 = vpop.f32.mrf.mxu0  ;;  %970 = vmax.xlane.f32.xlu1 %v969_v40 }
 0x35b   : > { %v1136_v42 = vpop.f32.mrf.mxu0 }
 0x35c   : > { %v1140_v43 = vsel %vm556_vm2, %v1136_v42, -inf }
 0x35d   : > { %1141 = vmax.xlane.f32.xlu0 %v1140_v43  ;;  %v1735_v44 = vpop.f32.mrf.mxu0 }
 0x36a   : > { %643 = vrot.lane.b32.xlu1 %v2119_v23, %s1948_s22  ;;  %s1952_s22 = smov 8  }
 0x3d5   : > { %v634_v45 = vpop.xlane.xlu1 %633 }
 0x3d6   : > { %v635_v46 = vsub.f32 %v628_v33, %v634_v45 }
 0x3d8   : > { %v636_v47 = vmul.f32 1.442695, %v635_v46  ;;  %v1351_v46 = vld [vmem:[%s2340_s9 + $0x18] sm:$0xff] }
 0x3d9   : > { %v800_v48 = vpop.xlane.xlu0 %799 }
 0x3da   : > { %1855 = vpow2.f32 %v636_v47  ;;  %v801_v49 = vsub.f32 %v794_v36, %v800_v48  ;;  %v1349_v47 = vld [vmem:[%s2340_s9 + $0x8] sm:$0xff]  ;;  %v1348_v48 = vld [vmem:[%s2340_s9] sm:$0xff] }
 0x3dc   : > { %v802_v50 = vmul.f32 1.442695, %v801_v49 }
 0x3de   : > { %1857 = vpow2.f32 %v802_v50 }
 0x3e2   : > { %v971_v51 = vpop.xlane.xlu1 %970 }
 0x3e3   : > { %v972_v52 = vsub.f32 %v965_v39, %v971_v51 }
 0x3e5   : > { %v973_v53 = vmul.f32 1.442695, %v972_v52 }
 0x3e6   : > { %v1142_v54 = vpop.xlane.xlu0 %1141  ;;  %v644_v55 = vpop.permute.xlu1 %643 }
 0x3e7   : > { %v1856_v56 = vpop.eup %1855  ;;  %1859 = vpow2.f32 %v973_v53  ;;  %v1143_v57 = vsub.f32 %v1136_v42, %v1142_v54  ;;  %1707 = vmatpush3.msra.mxu1 %v644_v55  ;;  %v1632_v53 = vld [vmem:[%s2338_s7] ss:$0 sm:$0xff] }
 0x3e8   : > { %v638_v58 = vsel %vm556_vm2, %v1856_v56, 0.0  ;;  %1716 = vmatprep.subr.mxu1 %v1939_v8  ;;  %v1633_v55 = vld [vmem:[%s2339_s8] ss:$0 sm:$0xff] }
 0x3e9   : > { %v1144_v59 = vmul.f32 1.442695, %v1143_v57  ;;  %639 = vadd.xlane.f32.xlu1 %v638_v58  ;;  %v1455_v58 = vld [vmem:[%s2342_s11 + $0x78] sm:$0xff] }
 0x3ea   : > { %1764 = vmatpush3.msra.mxu0 %v1455_v58 }
 0x3eb   : > { %v1858_v60 = vpop.eup %1857  ;;  %1861 = vpow2.f32 %v1144_v59  ;;  %1765 = vmatprep.subr.mxu0 %v1939_v8  ;;  %v1454_v59 = vld [vmem:[%s2342_s11 + $0x70] sm:$0xff] }
 0x3ec   : > { %v804_v61 = vsel %vm556_vm2, %v1858_v60, 0.0  ;;  %1766 = vmatpush3.msra.mxu0 %v1454_v59 }
 0x3ed   : > { %805 = vadd.xlane.f32.xlu0 %v804_v61  ;;  %1767 = vmatprep.subr.mxu0 %v1939_v8  ;;  %v1452_v61 = vld [vmem:[%s2342_s11 + $0x60] sm:$0xff] }
 0x3f4   : > { %v1860_v62 = vpop.eup %1859 }
 0x3f5   : > { %v975_v63 = vsel %vm556_vm2, %v1860_v62, 0.0 }
 0x3f6   : > { %976 = vadd.xlane.f32.xlu1 %v975_v63  ;;  %v1450_v63 = vld [vmem:[%s2342_s11 + $0x50] sm:$0xff] }
 0x3f8   : > { %v1862_v1 = vpop.eup %1861 }
 0x3f9   : > { %v1146_v2 = vsel %vm556_vm2, %v1862_v1, 0.0 }
 0x3fa   : > { %1147 = vadd.xlane.f32.xlu0 %v1146_v2  ;;  %v1448_v2 = vld [vmem:[%s2342_s11 + $0x40] sm:$0xff] }
 0x407   : > { %980 = vrot.lane.b32.xlu1 %v2119_v23, %s1949_s23 }
 0x40b   : > { %1151 = vrot.lane.b32.xlu1 %v2119_v23, %s1950_s24 }
 0x410   : > { %809 = vrot.lane.b32.xlu0 %v2119_v23, %s1951_s30  ;;  %s1639_s30 = sshll.u32 %s2047_s29, 7  ;;  %s1955_s29 = smov [#allocation3]  }
 0x411   : > { %s1547_s1 = scalar_lea.hbm %s2344_s13, %s1639_s30 }
 0x472   : > { %v640_v3 = vpop.xlane.xlu1 %639 }
 0x473   : > { %1863 = vrcp.f32 %v640_v3  ;;  %v1447_v3 = vld [vmem:[%s2342_s11 + $0x38] sm:$0xff] }
 0x476   : > { %v806_v4 = vpop.xlane.xlu0 %805 }
 0x477   : > { %1865 = vrcp.f32 %v806_v4  ;;  %v1446_v4 = vld [vmem:[%s2342_s11 + $0x30] sm:$0xff] }
 0x47f   : > { %v977_v5 = vpop.xlane.xlu1 %976 }
 0x480   : > { %v1864_v6 = vpop.eup %1863  ;;  %1867 = vrcp.f32 %v977_v5  ;;  %v1445_v5 = vld [vmem:[%s2342_s11 + $0x28] sm:$0xff] }
 0x481   : > { %v642_v7 = vmul.f32 %v1864_v6, %v1856_v56  ;;  %v1444_v6 = vld [vmem:[%s2342_s11 + $0x20] sm:$0xff] }
 0x483   : > { %v1148_v9 = vpop.xlane.xlu0 %1147  ;;  %1709 = vmatmul.mubr.msk.f32.vlgmr.msra.gmra.mxu1 %vm556_vm2, %v642_v7  ;;  %v981_v13 = vpop.permute.xlu1 %980  ;;  %v1443_v7 = vld [vmem:[%s2342_s11 + $0x18] sm:$0xff] }
 0x484   : > { %v1866_v10 = vpop.eup %1865  ;;  %1869 = vrcp.f32 %v1148_v9  ;;  %1718 = vmatprep.mubr.msk.f32.mxu1 %vm1940_vm1, %v1939_v8  ;;  %v1442_v9 = vld [vmem:[%s2342_s11 + $0x10] sm:$0xff] }
 0x485   : > { %v808_v12 = vmul.f32 %v1866_v10, %v1858_v60  ;;  %v1453_v60 = vld [vmem:[%s2342_s11 + $0x68] sm:$0xff] }
 0x486   : > { %1768 = vmatpush3.msra.mxu0 %v1453_v60  ;;  %v1441_v10 = vld [vmem:[%s2342_s11 + $0x8] sm:$0xff] }
 0x487   : > { %v810_v11 = vpop.permute.xlu0 %809  ;;  %v1152_v16 = vpop.permute.xlu1 %1151  ;;  %1769 = vmatprep.subr.mxu0 %v1939_v8 }
 0x488   : > { %1717 = vmatpush3.msra.mxu1 %v810_v11  ;;  %1770 = vmatpush3.msra.mxu0 %v1452_v61  ;;  %v1440_v11 = vld [vmem:[%s2342_s11] sm:$0xff] }
 0x489   : > { %1719 = vmatmul.mubr.msk.f32.vlgmr.msra.gmra.mxu1 %vm556_vm2, %v808_v12  ;;  %1726 = vmatprep.subr.mxu1 %v1939_v8  ;;  %v1634_v12 = vld [vmem:[%s2341_s10] ss:$0 sm:$0xff] }
 0x48a   : > { %1727 = vmatpush3.msra.mxu1 %v981_v13  ;;  %1728 = vmatprep.mubr.msk.f32.mxu1 %vm1940_vm1, %v1939_v8 }
 0x48b   : > { %1736 = vmatprep.subr.mxu1 %v1939_v8  ;;  %1771 = vmatprep.subr.mxu0 %v1939_v8 }
 0x48d   : > { %v1868_v14 = vpop.eup %1867 }
 0x48e   : > { %v979_v15 = vmul.f32 %v1868_v14, %v1860_v62  ;;  %v1451_v62 = vld [vmem:[%s2342_s11 + $0x58] sm:$0xff] }
 0x48f   : > { %1772 = vmatpush3.msra.mxu0 %v1451_v62 }
 0x490   : > { %1729 = vmatmul.mubr.msk.f32.vlgmr.msra.gmra.mxu1 %vm556_vm2, %v979_v15  ;;  %1773 = vmatprep.subr.mxu0 %v1939_v8 }
 0x491   : > { %v1870_v17 = vpop.eup %1869  ;;  %1737 = vmatpush3.msra.mxu1 %v1152_v16  ;;  %1738 = vmatprep.mubr.msk.f32.mxu1 %vm1940_vm1, %v1939_v8 }
 0x492   : > { %v1150_v18 = vmul.f32 %v1870_v17, %v1862_v1  ;;  %1741 = vmatprep.subr.mxu1 %v1939_v8  ;;  %1774 = vmatpush3.msra.mxu0 %v1450_v63  ;;  %v1449_v1 = vld [vmem:[%s2342_s11 + $0x48] sm:$0xff] }
 0x493   : > { %1775 = vmatprep.subr.mxu0 %v1939_v8 }
 0x494   : > { %1739 = vmatmul.mubr.msk.f32.vlgmr.msra.gmra.mxu1 %vm556_vm2, %v1150_v18  ;;  %1776 = vmatpush3.msra.mxu0 %v1449_v1 }
 0x495   : > { %1749 = vmatprep.mubr.msk.f32.mxu1 %vm1940_vm1, %v1939_v8  ;;  %1742 = vmatpush3.msra.mxu1 %v1237_v21 }
 0x496   : > { %1743 = vmatprep.subr.mxu1 %v1939_v8  ;;  %1777 = vmatprep.subr.mxu0 %v1939_v8 }
 0x497   : > { %1744 = vmatpush3.msra.mxu1 %v1236_v22  ;;  %1778 = vmatpush3.msra.mxu0 %v1448_v2 }
 0x498   : > { %1745 = vmatprep.subr.mxu1 %v1939_v8  ;;  %1779 = vmatprep.subr.mxu0 %v1939_v8 }
 0x499   : > { %1746 = vmatpush3.msra.mxu1 %v1235_v24  ;;  %1780 = vmatpush3.msra.mxu0 %v1447_v3 }
 0x49a   : > { %1747 = vmatprep.subr.mxu1 %v1939_v8  ;;  %1781 = vmatprep.subr.mxu0 %v1939_v8 }
 0x49b   : > { %1748 = vmatpush3.msra.mxu1 %v1234_v26  ;;  %1782 = vmatpush3.msra.mxu0 %v1446_v4 }
 0x49c   : > { %1752 = vmatprep.subr.mxu1 %v1939_v8  ;;  %1783 = vmatprep.subr.mxu0 %v1939_v8 }
 0x49d   : > { %1784 = vmatpush3.msra.mxu0 %v1445_v5 }
 0x49e   : > { %1785 = vmatprep.subr.mxu0 %v1939_v8 }
 0x49f   : > { %1786 = vmatpush3.msra.mxu0 %v1444_v6 }
 0x4a0   : > { %1787 = vmatprep.subr.mxu0 %v1939_v8 }
 0x4a1   : > { %1788 = vmatpush3.msra.mxu0 %v1443_v7 }
 0x4a2   : > { %1789 = vmatprep.subr.mxu0 %v1939_v8 }
 0x4a3   : > { %1790 = vmatpush3.msra.mxu0 %v1442_v9 }
 0x4a4   : > { %1791 = vmatprep.subr.mxu0 %v1939_v8 }
 0x4a5   : > { %1792 = vmatpush3.msra.mxu0 %v1441_v10 }
 0x4a6   : > { %1793 = vmatprep.subr.mxu0 %v1939_v8 }
 0x4a7   : > { %1794 = vmatpush3.msra.mxu0 %v1440_v11 }
 0x543   : > { %v715_v19 = vpop.f32.mrf.mxu1 }
 0x544   : > { %719 = vst.msk [vmem:[#allocation2] sm:$0xff] %vm556_vm2, %v715_v19 }
 0x545   : > { %v1710_v20 = vpop.f32.mrf.mxu1 }
 0x549   : > { %v881_v23 = vpop.f32.mrf.mxu1 }
 0x54a   : > { %886 = vrot.lane.b32.xlu0 %v881_v23, %s1952_s22  ;;  %s1612_s22 = sshll.u32 %s429_s21, 3 }
 0x54b   : > { %v1720_v25 = vpop.f32.mrf.mxu1  ;;  %s431_s15 = scalar_lea.vmem [#allocation3], %s1612_s22  ;;  %s1881_s22 = sshll.u32 %s1955_s29, 4  ;;  %s1882_s22 = int_to_ptr.vmem [resolvable:$false] %s1881_s22 }
 0x54c   : > { %s1883_s23 = scalar_lea.vmem %s1882_s22, 256 }
 0x550   : > { %v1052_v27 = vpop.f32.mrf.mxu1 }
 0x551   : > { %1057 = vrot.lane.b32.xlu1 %v1052_v27, %s1953_s16  ;;  %s1549_s16 = sshll.u32 %s431_s15, 4  ;;  %s1550_s16 = int_to_ptr.vmem [resolvable:$true] %s1549_s16 }
 0x552   : > { %v1730_v28 = vpop.f32.mrf.mxu1  ;;  %s1877_s3 = scalar_lea.vmem %s1550_s16, 128  ;;  %p1884_p0 = scmp.lt.s32.totalorder %s1550_s16, %s1882_s22 }
 0x553   : > { %p1878_p11 = scmp.ne.s32.totalorder %s1550_s16, %s1877_s3  ;;  %p1885_p1 = scmp.lt.s32.totalorder %s1883_s23, %s1877_s3 }
 0x554   : > { %v1223_v29 = vpop.f32.mrf.mxu1 }
 0x555   : > { %1228 = vrot.lane.b32.xlu0 %v1223_v29, %s1954_s20  ;;  %p1879_p12 = pnand %p1878_p11, %p2064_p5  ;;  %p1886_p2 = por %p1885_p1, %p1884_p0 }
 0x556   : > { %v1740_v30 = vpop.f32.mrf.mxu1 }
 0x557   : > { %p1880_p13 = pneg %p1879_p12 }
 0x559   : > { %p1887_p3 = pnand %p1886_p2, %p1880_p13 }
 0x5bc   : > { %v887_v31 = vpop.permute.xlu0 %886 }
 0x5bd   : > { %890 = vst.msk [vmem:[#allocation2] sm:$0xff] %vm889_vm3, %v887_v31 }
 0x5c3   : > { %v1058_v32 = vpop.permute.xlu1 %1057 }
 0x5c4   : > { %1061 = vst.msk [vmem:[#allocation2] sm:$0xff] %vm1060_vm4, %v1058_v32 }
 0x5c7   : > { %v1229_v33 = vpop.permute.xlu0 %1228 }
 0x5c8   : > { %1232 = vst.msk [vmem:[#allocation2] sm:$0xff] %vm1231_vm5, %v1229_v33 }
 0x5cf   : > { %v1233_v34 = vld [vmem:[#allocation2] sm:$0xff] }
 0x5d0   : > { %1750 = vmatmul.mubr.msk.f32.vlgmr.msra.gmra.mxu1 %vm439_vm0, %v1233_v34 }
 0x5d1   : > { %1760 = vmatprep.mubr.msk.f32.mxu1 %vm1940_vm1, %v1939_v8  ;;  %1753 = vmatpush3.msra.mxu1 %v1351_v46 }
 0x5d2   : > { %1754 = vmatprep.subr.mxu1 %v1939_v8 }
 0x690   : > { %v1314_v36 = vpop.f32.mrf.mxu1 }
 0x691   : > { %v1315_v37 = vadd.f32 %v1630_v35, %v1314_v36 }
 0x692   : > { %v1751_v38 = vpop.f32.mrf.mxu1 }
 0x693   : > { %v2198_v39 = vadd.f32 %v1315_v37, %v2079_v0  ;;  %v1350_v0 = vld [vmem:[%s2340_s9 + $0x10] sm:$0xff] }
 0x694   : > { %1755 = vmatpush3.msra.mxu1 %v1350_v0 }
 0x695   : > { %v1321_v40 = vsel %vm439_vm0, %v2198_v39, 0.0  ;;  %1756 = vmatprep.subr.mxu1 %v1939_v8 }
 0x696   : > { %1322 = vadd.xlane.f32.xlu1 %v1321_v40  ;;  %1757 = vmatpush3.msra.mxu1 %v1349_v47 }
 0x697   : > { %1758 = vmatprep.subr.mxu1 %v1939_v8  ;;  %v1637_v8 = vld [vmem:[%s2343_s12] ss:$0 sm:$0xff] }
 0x698   : > { %1759 = vmatpush3.msra.mxu1 %v1348_v48 }
 0x71f   : > { %v1323_v41 = vpop.xlane.xlu1 %1322 }
 0x720   : > { %v1324_v42 = vmul.f32 0.03125, %v1323_v41 }
 0x722   : > { %v1325_v43 = vsub.f32 %v2198_v39, %v1324_v42 }
 0x724   : > { %v1326_v44 = vmul.f32 %v1325_v43, %v1325_v43 }
 0x726   : > { %v1327_v45 = vsel %vm439_vm0, %v1326_v44, 0.0 }
 0x727   : > { %1328 = vadd.xlane.f32.xlu0 %v1327_v45 }
 0x7b0   : > { %v1329_v49 = vpop.xlane.xlu0 %1328 }
 0x7b1   : > { %v1330_v50 = vmul.f32 0.03125, %v1329_v49 }
 0x7b3   : > { %v1331_v51 = vadd.f32 1e-05, %v1330_v50 }
 0x7b5   : > { %1871 = vrsqrt.f32 %v1331_v51 }
 0x7c2   : > { %v1872_v52 = vpop.eup %1871 }
 0x7c3   : > { %v1333_v54 = vmul.f32 %v1872_v52, %v1325_v43 }
 0x7c5   : > { %v1340_v56 = vmul.f32 %v1632_v53, %v1333_v54 }
 0x7c7   : > { %v1347_v57 = vadd.f32 %v1633_v55, %v1340_v56 }
 0x7c9   : > { %1761 = vmatmul.mubr.msk.f32.vlgmr.msra.gmra.mxu1 %vm439_vm0, %v1347_v57 }
 0x889   : > { %v1428_v13 = vpop.f32.mrf.mxu1 }
 0x88a   : > { %v1429_v14 = vadd.f32 %v1634_v12, %v1428_v13 }
 0x88b   : > { %v1762_v15 = vpop.f32.mrf.mxu1 }
 0x88c   : > { %v1636_v16 = vmul.f32 -1.702, %v1429_v14 }
 0x88e   : > { %v1434_v17 = vmul.f32 1.442695, %v1636_v16 }
 0x890   : > { %1873 = vpow2.f32 %v1434_v17 }
 0x89d   : > { %v1874_v18 = vpop.eup %1873 }
 0x89e   : > { %v1436_v19 = vadd.f32 1.0, %v1874_v18 }
 0x8a0   : > { %1875 = vrcp.f32 %v1436_v19 }
 0x8ad   : > { %v1876_v20 = vpop.eup %1875 }
 0x8ae   : > { %v1439_v21 = vmul.f32 %v1876_v20, %v1429_v14 }
 0x8b0   : > { %1796 = vmatmul.mubr.f32.vlgmr.msra.gmra.mxu0 %v1439_v21 }
 0x970   : > { %v1529_v22 = vpop.f32.mrf.mxu0 }
 0x971   : > { %v1530_v23 = vadd.f32 %v1637_v8, %v1529_v22 }
 0x972   : > { %v1797_v24 = vpop.f32.mrf.mxu0 }
 0x973   : > { %v1533_v25 = vadd.f32 %v1530_v23, %v2198_v39 }
 0x975   : > { %1534 = vst.msk [vmem:[%s431_s15] sm:$0xff] %vm439_vm0, %v1533_v25 }
 0x976   : > { %1890 = shalt.err (!%p1887_p3)
}
 0x977   : > { %s1891_s0 = scalar_lea.hbm %s1547_s1, 128  ;;  %s1895_s30 = scalar_lea.hbm %s2344_s13, 256 }
 0x978   : > { %p1892_p4 = scmp.ne.s32.totalorder %s1547_s1, %s1891_s0  ;;  %p1896_p9 = scmp.lt.s32.totalorder %s1547_s1, %s2344_s13 }
 0x979   : > { %p1897_p10 = scmp.lt.s32.totalorder %s1895_s30, %s1891_s0 }
 0x97a   : > { %p1893_p7 = pnand %p1892_p4, %p2064_p5 }
 0x97b   : > { %p1898_p11 = por %p1897_p10, %p1896_p9 }
 0x97c   : > { %p1894_p8 = pneg %p1893_p7 }
 0x97e   : > { %p1899_p12 = pnand %p1898_p11, %p1894_p8 }
 0x980   : > { %1902 = shalt.err (!%p1899_p12)
}
 0x981   : > { %1798 = dma.vmem_to_hbm [thread:$0]  (%p2064_p5), %s1550_s16, 128, %s1547_s1, %s1536_s2  }
 0x982 PF: > { %p1804_p13 = scmp.ge.s32.totalorder %s1937_s28, 2  ;;  %s1561_s3 = sand.u32 1, %s1925_s25  }
 0x983   : > { %s1562_s29 = scalar_lea.sflag [#allocation4], %s1561_s3 }
 0x984   : > { %p1801_p0 = pnand %p1804_p13, %p2068_p6 }
 0x986   : > { %p1802_p1 = pneg %p1801_p0 }
 0x988   : > { %1920 = dma.done.wait (%p1802_p1), %s1562_s29, 128  }
 0x989   : > { %1922 = vsyncadd (%p1802_p1), %s1562_s29, 4294967168  ;;  %p23_p2 = scmp.ge.s32.totalorder %s2051_s14, 4   ;;  %s2355_s25 = smov %s1929_s26 }
 0x98a   : > { %s2356_s26 = smov %s1933_s27  ;;  %s2357_s27 = smov %s2062_s17 }
 0x98b   : > { %s2358_s28 = smov %s2051_s14  ;;  %25 = sbr.rel (!%p23_p2) target bundleno = 8 (0x8), region = 107 }
 0x990   :  { %1567 = vsyncpa [#allocation4], 1 }
 0x991   :  { %1569 = vsyncpa [#allocation4 + $0x1], 1 }

</bundles_post_ra>
